<compile_context>
chip_gen: v5e
topology: v5e:2x2
jax: 0.10.0
libtpu: 0.0.40
codegen_flags: <defaults>
</compile_context>

<pallas_src>
import functools
import jax
import jax.numpy as jnp
from jax.experimental import pallas as pl
from jax.experimental.pallas import tpu as pltpu

# ---------------- model dims (scaled-down stand-ins) ----------------
D_VIT   = 64      # stands for 768
D_LLM   = 128     # stands for 4096
VOCAB   = 256
N_HEADS = 4
D_HEAD  = D_LLM // N_HEADS
D_FFN   = 256
LORA_R  = 8
LORA_ALPHA = 32
LORA_SCALE = LORA_ALPHA / LORA_R      # = 4.0
PATCH   = 16
IMG     = 32                          # 32x32 image -> 4 patches
N_PATCH = (IMG // PATCH) ** 2
S_IMG   = N_PATCH + 1                 # + CLS token (ViT last_hidden_state)
BOS_ID  = 1
PAD_ID  = 2                           # pad_token = eos_token
RMS_EPS = 1e-6
NEG_INF = -1e30


# ============================ Pallas kernels ============================

def _matmul_bias_kernel(x_ref, w_ref, b_ref, o_ref):
    x = x_ref[...].astype(jnp.bfloat16)
    o_ref[...] = (jnp.dot(x, w_ref[...], preferred_element_type=jnp.float32)
                  + b_ref[...])


def matmul_bias(x2d, w_bf16, b):
    """y = x @ w + b.  x2d:(M,K) f32, w:(K,N) bf16, b:(N,) f32 -> (M,N) f32."""
    M = x2d.shape[0]
    N = w_bf16.shape[1]
    return pl.pallas_call(
        _matmul_bias_kernel,
        out_shape=jax.ShapeDtypeStruct((M, N), jnp.float32),
    )(x2d, w_bf16, b.reshape(1, N))


def _rms_matmul_kernel(x_ref, g_ref, w_ref, o_ref):
    x = x_ref[...]                                           # f32
    var = jnp.mean(x * x, axis=-1, keepdims=True)
    h = (x * jax.lax.rsqrt(var + RMS_EPS) * g_ref[...]).astype(jnp.bfloat16)
    o_ref[...] = jnp.dot(h, w_ref[...], preferred_element_type=jnp.float32)


def rms_matmul(x2d, gamma, w_bf16):
    """y = rmsnorm(x) @ w  (norm fused into the projection)."""
    M, D = x2d.shape
    N = w_bf16.shape[1]
    return pl.pallas_call(
        _rms_matmul_kernel,
        out_shape=jax.ShapeDtypeStruct((M, N), jnp.float32),
    )(x2d, gamma.reshape(1, D), w_bf16)


def _matmul_residual_kernel(x_ref, w_ref, r_ref, o_ref):
    x = x_ref[...].astype(jnp.bfloat16)
    o_ref[...] = r_ref[...] + jnp.dot(x, w_ref[...],
                                      preferred_element_type=jnp.float32)


def matmul_residual(x2d, w_bf16, resid):
    """y = resid + x @ w   (attention output projection + residual)."""
    M = x2d.shape[0]
    N = w_bf16.shape[1]
    return pl.pallas_call(
        _matmul_residual_kernel,
        out_shape=jax.ShapeDtypeStruct((M, N), jnp.float32),
    )(x2d, w_bf16, resid)


def _attn_kernel(scale, n_heads, d_head, q_ref, k_ref, v_ref, m_ref, o_ref):
    T = q_ref.shape[1]
    q = q_ref[0]                                            # (T, H*Dh) f32
    k = k_ref[0]
    v = v_ref[0]
    key_mask = m_ref[0]                                     # (1, T) f32
    row = jax.lax.broadcasted_iota(jnp.int32, (T, T), 0)
    col = jax.lax.broadcasted_iota(jnp.int32, (T, T), 1)
    ok = (col <= row) & (key_mask > 0.5)                    # causal & padding
    for h in range(n_heads):
        sl = slice(h * d_head, (h + 1) * d_head)
        qh = q[:, sl].astype(jnp.bfloat16)
        kh = k[:, sl].astype(jnp.bfloat16)
        vh = v[:, sl].astype(jnp.bfloat16)
        s = jax.lax.dot_general(qh, kh, (((1,), (1,)), ((), ())),
                                preferred_element_type=jnp.float32) * scale
        s = jnp.where(ok, s, NEG_INF)
        s = s - jnp.max(s, axis=-1, keepdims=True)
        p = jnp.exp(s)
        p = p * pl.reciprocal(jnp.sum(p, axis=-1, keepdims=True), approx=True)
        oh = jnp.dot(p.astype(jnp.bfloat16), vh,
                     preferred_element_type=jnp.float32)
        o_ref[0, :, sl] = oh


def causal_attention(q, k, v, attn_mask):
    """q,k,v: [B,T,H*Dh] (head-stacked, lane-dense); attn_mask: [B,T]."""
    B, T, D = q.shape
    scale = 1.0 / (D_HEAD ** 0.5)
    mask3 = attn_mask.reshape(B, 1, T).astype(jnp.float32)
    return pl.pallas_call(
        functools.partial(_attn_kernel, scale, N_HEADS, D_HEAD),
        out_shape=jax.ShapeDtypeStruct((B, T, D), jnp.float32),
        grid=(B,),
        in_specs=[pl.BlockSpec((1, T, D), lambda b: (b, 0, 0)),
                  pl.BlockSpec((1, T, D), lambda b: (b, 0, 0)),
                  pl.BlockSpec((1, T, D), lambda b: (b, 0, 0)),
                  pl.BlockSpec((1, 1, T), lambda b: (b, 0, 0))],
        out_specs=pl.BlockSpec((1, T, D), lambda b: (b, 0, 0)),
        compiler_params=pltpu.CompilerParams(
            dimension_semantics=("parallel",)),
    )(q, k, v, mask3)


def _mlp_kernel(ffn, x_ref, g_ref, wgu_ref, wd_ref, o_ref):
    x = x_ref[...]                                          # f32 residual
    var = jnp.mean(x * x, axis=-1, keepdims=True)
    h = (x * jax.lax.rsqrt(var + RMS_EPS) * g_ref[...]).astype(jnp.bfloat16)
    gu = jnp.dot(h, wgu_ref[...], preferred_element_type=jnp.float32)
    g = gu[:, :ffn]
    u = gu[:, ffn:]
    act = (g * jax.nn.sigmoid(g) * u).astype(jnp.bfloat16)  # SiLU(g) * u
    o_ref[...] = x + jnp.dot(act, wd_ref[...],
                             preferred_element_type=jnp.float32)


def mlp_block(x2d, gamma, w_gu_bf16, w_down_bf16):
    """y = x + SwiGLU(rmsnorm(x) @ [Wg|Wu]) @ Wdown   (fully fused)."""
    M, D = x2d.shape
    return pl.pallas_call(
        functools.partial(_mlp_kernel, D_FFN),
        out_shape=jax.ShapeDtypeStruct((M, D), jnp.float32),
    )(x2d, gamma.reshape(1, D), w_gu_bf16, w_down_bf16)


def _head_ce_kernel(x_ref, g_ref, w_ref, lbl_ref, logits_ref, loss_ref,
                    valid_ref):
    x = x_ref[...]
    var = jnp.mean(x * x, axis=-1, keepdims=True)
    h = (x * jax.lax.rsqrt(var + RMS_EPS) * g_ref[...]).astype(jnp.bfloat16)
    logits = jnp.dot(h, w_ref[...], preferred_element_type=jnp.float32)
    logits_ref[...] = logits                                 # emitted output
    labels = lbl_ref[...]                                    # (M, 1) int32
    mx = jnp.max(logits, axis=-1, keepdims=True)
    lse = mx + jnp.log(jnp.sum(jnp.exp(logits - mx), axis=-1, keepdims=True))
    col = jax.lax.broadcasted_iota(jnp.int32, logits.shape, 1)
    picked = jnp.sum(jnp.where(col == labels, logits, 0.0),
                     axis=-1, keepdims=True)
    valid = (labels != -100).astype(jnp.float32)
    loss_ref[...] = (lse - picked) * valid
    valid_ref[...] = valid


def head_ce(x2d, gamma, w_lm_bf16, labels1d):
    """Fused final rmsnorm + lm_head + per-token CE (ignore_index=-100)."""
    M, D = x2d.shape
    V = w_lm_bf16.shape[1]
    labels = labels1d.reshape(M, 1).astype(jnp.int32)
    logits, loss, valid = pl.pallas_call(
        _head_ce_kernel,
        out_shape=(jax.ShapeDtypeStruct((M, V), jnp.float32),
                   jax.ShapeDtypeStruct((M, 1), jnp.float32),
                   jax.ShapeDtypeStruct((M, 1), jnp.float32)),
    )(x2d, gamma.reshape(1, D), w_lm_bf16, labels)
    mean_loss = jnp.sum(loss) / jnp.maximum(jnp.sum(valid), 1.0)
    return logits, mean_loss


# ============================ parameters ============================

def init_params(key):
    ks = iter(jax.random.split(key, 40))
    n = lambda shape, s=0.05: (s * jax.random.normal(next(ks), shape)
                               ).astype(jnp.float32)
    p = {}
    # "ViT" visual encoder stand-in: patch-embedding conv-as-matmul.
    p["patch_w"] = n((3 * PATCH * PATCH, D_VIT))
    p["patch_b"] = n((D_VIT,))
    p["cls_tok"] = n((1, 1, D_VIT))
    p["pos_emb"] = n((1, S_IMG, D_VIT))
    # projection = nn.Linear(768, 4096)
    p["proj_w"] = n((D_VIT, D_LLM))
    p["proj_b"] = n((D_LLM,))
    # embed_tokens
    p["embed"] = n((VOCAB, D_LLM), 0.02)
    # one LLaMA-style decoder layer, LoRA on every target module
    def lora(k_in, k_out):
        return {"w": n((k_in, k_out)), "a": n((k_in, LORA_R)),
                "b": n((LORA_R, k_out), 0.01)}
    for name, (ki, ko) in {
        "q": (D_LLM, D_LLM), "k": (D_LLM, D_LLM),
        "v": (D_LLM, D_LLM), "o": (D_LLM, D_LLM),
        "gate": (D_LLM, D_FFN), "up": (D_LLM, D_FFN),
        "down": (D_FFN, D_LLM), "lm_head": (D_LLM, VOCAB),
    }.items():
        p[name] = lora(ki, ko)
    p["norm1_g"] = jnp.ones((D_LLM,), jnp.float32)
    p["norm2_g"] = jnp.ones((D_LLM,), jnp.float32)
    p["norm_f_g"] = jnp.ones((D_LLM,), jnp.float32)
    return p


def fold_lora(lp):
    """w_eff = w + (alpha/r) * A @ B, cast to bf16 for the MXU."""
    # TODO(synk): LoRA dropout (p=0.05) is omitted (deterministic kernel).
    return (lp["w"] + LORA_SCALE * (lp["a"] @ lp["b"])).astype(jnp.bfloat16)


# ============================ forward pass ============================

def visual_encoder(params, image):
    """image: [B,3,H,W] NCHW -> (att_img [B,S_IMG+1], img_proj [B,S_IMG,D_LLM])."""
    B = image.shape[0]
    # extract non-overlapping 16x16 patches (glue)
    x = image.reshape(B, 3, IMG // PATCH, PATCH, IMG // PATCH, PATCH)
    x = x.transpose(0, 2, 4, 1, 3, 5).reshape(B * N_PATCH, 3 * PATCH * PATCH)
    # patch embedding (Conv2d stride-16 == matmul) in Pallas
    patch_emb = matmul_bias(x, params["patch_w"].astype(jnp.bfloat16),
                            params["patch_b"])
    patch_emb = patch_emb.reshape(B, N_PATCH, D_VIT)
    cls = jnp.broadcast_to(params["cls_tok"], (B, 1, D_VIT))
    vit_hidden = jnp.concatenate([cls, patch_emb], axis=1) + params["pos_emb"]
    # TODO(synk): frozen pretrained 12-layer ViT encoder stack not reproduced.
    img_proj = matmul_bias(vit_hidden.reshape(B * S_IMG, D_VIT),
                           params["proj_w"].astype(jnp.bfloat16),
                           params["proj_b"]).reshape(B, S_IMG, D_LLM)
    att_img = jnp.ones((B, S_IMG + 1), jnp.float32)
    return att_img, img_proj


def decoder_layer(params, w_qkv, w_o, w_gu, w_down, x, attn_mask):
    """x: [B,T,D_LLM], attn_mask: [B,T] -> [B,T,D_LLM]."""
    B, T, D = x.shape
    flat = x.reshape(B * T, D)
    # fused rmsnorm + q|k|v projection
    qkv = rms_matmul(flat, params["norm1_g"], w_qkv)          # (M, 3D)
    q = qkv[:, :D].reshape(B, T, D)
    k = qkv[:, D:2 * D].reshape(B, T, D)
    v = qkv[:, 2 * D:].reshape(B, T, D)
    attn = causal_attention(q, k, v, attn_mask)               # (B, T, D)
    # output projection + residual
    x1 = matmul_residual(attn.reshape(B * T, D), w_o, flat)
    # fused rmsnorm + gate|up + SwiGLU + down + residual
    x2 = mlp_block(x1, params["norm2_g"], w_gu, w_down)
    return x2.reshape(B, T, D)


def multimodal_forward(params, image, input_ids, text_attn_mask):
    """Mirrors MultimodalLLM.forward(text, image); returns (loss, logits)."""
    B, T_TXT = input_ids.shape

    # Fold LoRA adapters into base weights; fuse q|k|v and gate|up along N.
    w_qkv = jnp.concatenate([fold_lora(params["q"]),
                             fold_lora(params["k"]),
                             fold_lora(params["v"])], axis=1)       # (D, 3D)
    w_o = fold_lora(params["o"])                                    # (D, D)
    w_gu = jnp.concatenate([fold_lora(params["gate"]),
                            fold_lora(params["up"])], axis=1)       # (D, 2F)
    w_down = fold_lora(params["down"])                              # (F, D)
    w_lm = fold_lora(params["lm_head"])                             # (D, V)

    att_img, img_proj = visual_encoder(params, image)

    # embed_tokens (gather - plain JAX glue)
    text_embeds = jnp.take(params["embed"], input_ids, axis=0)
    bos = jnp.full((B, 1), BOS_ID, jnp.int32)
    bos_embeds = jnp.take(params["embed"], bos, axis=0)

    input_embeds = jnp.concatenate([bos_embeds, img_proj, text_embeds], axis=1)
    attention_mask = jnp.concatenate(
        [att_img, text_attn_mask.astype(jnp.float32)], axis=1)

    # targets: ignore image+bos region and pad tokens
    targets_txt = jnp.where(input_ids == PAD_ID, -100, input_ids)
    empty_targets = jnp.full((B, S_IMG + 1), -100, jnp.int32)
    targets = jnp.concatenate([empty_targets, targets_txt], axis=1)

    # pad sequence (14 -> 16) for (8,128)-aligned blocks; pad rows are
    # masked out of attention (mask=0) and of the loss (label=-100).
    T_real = input_embeds.shape[1]
    T_pad = ((T_real + 7) // 8) * 8
    pad = T_pad - T_real
    if pad:
        input_embeds = jnp.pad(input_embeds, ((0, 0), (0, pad), (0, 0)))
        attention_mask = jnp.pad(attention_mask, ((0, 0), (0, pad)))
        targets = jnp.pad(targets, ((0, 0), (0, pad)), constant_values=-100)

    # LoRA-adapted causal LM (1 decoder layer stand-in)
    h = decoder_layer(params, w_qkv, w_o, w_gu, w_down,
                      input_embeds, attention_mask)

    # HF-style shifted causal-LM loss: position t predicts targets[t+1]
    shift_labels = jnp.concatenate(
        [targets[:, 1:], jnp.full((B, 1), -100, jnp.int32)], axis=1)

    logits_flat, loss = head_ce(h.reshape(B * T_pad, D_LLM),
                                params["norm_f_g"], w_lm,
                                shift_labels.reshape(B * T_pad))
    logits = logits_flat.reshape(B, T_pad, VOCAB)[:, :T_real, :]
    return loss, logits


# ================================ main ================================

if __name__ == "__main__":
    key = jax.random.PRNGKey(0)
    k_param, k_img, k_ids = jax.random.split(key, 3)

    params = init_params(k_param)

    B, T_TXT = 2, 8
    image = jax.random.normal(k_img, (B, 3, IMG, IMG), jnp.float32)  # NCHW
    input_ids = jax.random.randint(k_ids, (B, T_TXT), 3, VOCAB, jnp.int32)
    # second example has 2 trailing pad tokens (padding='longest' semantics)
    input_ids = input_ids.at[1, 6:].set(PAD_ID)
    text_attn_mask = jnp.array([[1] * 8, [1] * 6 + [0] * 2], jnp.float32)

    loss, logits = jax.jit(multimodal_forward)(
        params, image, input_ids, text_attn_mask)
    jax.block_until_ready((loss, logits))

    assert logits.shape == (B, 1 + S_IMG + T_TXT, VOCAB)
    assert jnp.isfinite(loss)
    print("KERNEL_OK")
</pallas_src>

<mosaic_0001>
module attributes {stable_mosaic.version = 11 : i64} {
  func.func @_matmul_bias_kernel(%arg0: memref<8x768xf32, #tpu.memory_space<vmem>>, %arg1: memref<768x64xbf16, #tpu.memory_space<vmem>>, %arg2: memref<1x64xf32, #tpu.memory_space<vmem>>, %arg3: memref<8x64xf32, #tpu.memory_space<vmem>>) attributes {dimension_semantics = [], scalar_prefetch = 0 : i64, scratch_operands = 0 : i64, tpu.core_type = #tpu.core_type<tc>} {
    %c0 = arith.constant 0 : index
    %c0_0 = arith.constant 0 : index
    %0 = vector.load %arg0[%c0, %c0_0] : memref<8x768xf32, #tpu.memory_space<vmem>>, vector<8x768xf32>
    %1 = arith.truncf %0 : vector<8x768xf32> to vector<8x768xbf16>
    %c0_1 = arith.constant 0 : index
    %c0_2 = arith.constant 0 : index
    %2 = vector.load %arg1[%c0_1, %c0_2] : memref<768x64xbf16, #tpu.memory_space<vmem>>, vector<768x64xbf16>
    %cst = arith.constant dense<0.000000e+00> : vector<8x64xf32>
    %3 = tpu.matmul %1, %2, %cst {dimension_numbers = #tpu.dot_dimension_numbers<[1], [0], [0], [1], [0, 0, 1, 1], [], []>} : vector<8x768xbf16>, vector<768x64xbf16>, vector<8x64xf32> -> vector<8x64xf32>
    %c0_3 = arith.constant 0 : index
    %c0_4 = arith.constant 0 : index
    %4 = vector.load %arg2[%c0_3, %c0_4] : memref<1x64xf32, #tpu.memory_space<vmem>>, vector<1x64xf32>
    %5 = vector.broadcast %4 : vector<1x64xf32> to vector<8x64xf32>
    %6 = arith.addf %3, %5 : vector<8x64xf32>
    %c0_5 = arith.constant 0 : index
    %c0_6 = arith.constant 0 : index
    %7 = vector.load %arg3[%c0_5, %c0_6] : memref<8x64xf32, #tpu.memory_space<vmem>>, vector<8x64xf32>
    tpu.vector_store %arg3[%c0_5, %c0_6], %6 {strides = array<i32>} : memref<8x64xf32, #tpu.memory_space<vmem>>, vector<8x64xf32>,
    return
  }
}

module attributes {stable_mosaic.version = 11 : i64} {
  func.func @_matmul_bias_kernel(%arg0: memref<10x64xf32, #tpu.memory_space<vmem>>, %arg1: memref<64x128xbf16, #tpu.memory_space<vmem>>, %arg2: memref<1x128xf32, #tpu.memory_space<vmem>>, %arg3: memref<10x128xf32, #tpu.memory_space<vmem>>) attributes {dimension_semantics = [], scalar_prefetch = 0 : i64, scratch_operands = 0 : i64, tpu.core_type = #tpu.core_type<tc>} {
    %c0 = arith.constant 0 : index
    %c0_0 = arith.constant 0 : index
    %0 = vector.load %arg0[%c0, %c0_0] : memref<10x64xf32, #tpu.memory_space<vmem>>, vector<10x64xf32>
    %1 = arith.truncf %0 : vector<10x64xf32> to vector<10x64xbf16>
    %c0_1 = arith.constant 0 : index
    %c0_2 = arith.constant 0 : index
    %2 = vector.load %arg1[%c0_1, %c0_2] : memref<64x128xbf16, #tpu.memory_space<vmem>>, vector<64x128xbf16>
    %cst = arith.constant dense<0.000000e+00> : vector<10x128xf32>
    %3 = tpu.matmul %1, %2, %cst {dimension_numbers = #tpu.dot_dimension_numbers<[1], [0], [0], [1], [0, 0, 1, 1], [], []>} : vector<10x64xbf16>, vector<64x128xbf16>, vector<10x128xf32> -> vector<10x128xf32>
    %c0_3 = arith.constant 0 : index
    %c0_4 = arith.constant 0 : index
    %4 = vector.load %arg2[%c0_3, %c0_4] : memref<1x128xf32, #tpu.memory_space<vmem>>, vector<1x128xf32>
    %5 = vector.broadcast %4 : vector<1x128xf32> to vector<10x128xf32>
    %6 = arith.addf %3, %5 : vector<10x128xf32>
    %c0_5 = arith.constant 0 : index
    %c0_6 = arith.constant 0 : index
    %7 = vector.load %arg3[%c0_5, %c0_6] : memref<10x128xf32, #tpu.memory_space<vmem>>, vector<10x128xf32>
    tpu.vector_store %arg3[%c0_5, %c0_6], %6 {strides = array<i32>} : memref<10x128xf32, #tpu.memory_space<vmem>>, vector<10x128xf32>,
    return
  }
}

module attributes {stable_mosaic.version = 11 : i64} {
  func.func @_rms_matmul_kernel(%arg0: memref<32x128xf32, #tpu.memory_space<vmem>>, %arg1: memref<1x128xf32, #tpu.memory_space<vmem>>, %arg2: memref<128x384xbf16, #tpu.memory_space<vmem>>, %arg3: memref<32x384xf32, #tpu.memory_space<vmem>>) attributes {dimension_semantics = [], scalar_prefetch = 0 : i64, scratch_operands = 0 : i64, tpu.core_type = #tpu.core_type<tc>} {
    %c0 = arith.constant 0 : index
    %c0_0 = arith.constant 0 : index
    %0 = vector.load %arg0[%c0, %c0_0] : memref<32x128xf32, #tpu.memory_space<vmem>>, vector<32x128xf32>
    %1 = arith.mulf %0, %0 : vector<32x128xf32>
    %cst = arith.constant dense<0.000000e+00> : vector<32xf32>
    %2 = vector.multi_reduction <add>, %1, %cst [1] : vector<32x128xf32> to vector<32xf32>
    %3 = vector.shape_cast %2 : vector<32xf32> to vector<32x1xf32>
    %cst_1 = arith.constant 1.280000e+02 : f32
    %4 = vector.broadcast %cst_1 : f32 to vector<32x1xf32>
    %5 = arith.divf %3, %4 : vector<32x1xf32>
    %cst_2 = arith.constant 9.99999997E-7 : f32
    %6 = vector.broadcast %cst_2 : f32 to vector<32x1xf32>
    %7 = arith.addf %5, %6 : vector<32x1xf32>
    %8 = math.rsqrt %7 : vector<32x1xf32>
    %9 = vector.broadcast %8 : vector<32x1xf32> to vector<32x128xf32>
    %10 = arith.mulf %0, %9 : vector<32x128xf32>
    %c0_3 = arith.constant 0 : index
    %c0_4 = arith.constant 0 : index
    %11 = vector.load %arg1[%c0_3, %c0_4] : memref<1x128xf32, #tpu.memory_space<vmem>>, vector<1x128xf32>
    %12 = vector.broadcast %11 : vector<1x128xf32> to vector<32x128xf32>
    %13 = arith.mulf %10, %12 : vector<32x128xf32>
    %14 = arith.truncf %13 : vector<32x128xf32> to vector<32x128xbf16>
    %c0_5 = arith.constant 0 : index
    %c0_6 = arith.constant 0 : index
    %15 = vector.load %arg2[%c0_5, %c0_6] : memref<128x384xbf16, #tpu.memory_space<vmem>>, vector<128x384xbf16>
    %cst_7 = arith.constant dense<0.000000e+00> : vector<32x384xf32>
    %16 = tpu.matmul %14, %15, %cst_7 {dimension_numbers = #tpu.dot_dimension_numbers<[1], [0], [0], [1], [0, 0, 1, 1], [], []>} : vector<32x128xbf16>, vector<128x384xbf16>, vector<32x384xf32> -> vector<32x384xf32>
    %c0_8 = arith.constant 0 : index
    %c0_9 = arith.constant 0 : index
    %17 = vector.load %arg3[%c0_8, %c0_9] : memref<32x384xf32, #tpu.memory_space<vmem>>, vector<32x384xf32>
    tpu.vector_store %arg3[%c0_8, %c0_9], %16 {strides = array<i32>} : memref<32x384xf32, #tpu.memory_space<vmem>>, vector<32x384xf32>,
    return
  }
}

module attributes {stable_mosaic.version = 11 : i64} {
  func.func @_attn_kernel(%arg0: i32, %arg1: memref<1x16x128xf32, #tpu.memory_space<vmem>>, %arg2: memref<1x16x128xf32, #tpu.memory_space<vmem>>, %arg3: memref<1x16x128xf32, #tpu.memory_space<vmem>>, %arg4: memref<1x1x16xf32, #tpu.memory_space<vmem>>, %arg5: memref<1x16x128xf32, #tpu.memory_space<vmem>>) attributes {dimension_semantics = [#tpu.dimension_semantics<parallel>], iteration_bounds = array<i64: 2>, scalar_prefetch = 0 : i64, scratch_operands = 0 : i64, tpu.core_type = #tpu.core_type<tc>, window_params = [{transform_indices = @transform_0, window_bounds = array<i64: 1, 16, 128>}, {transform_indices = @transform_1, window_bounds = array<i64: 1, 16, 128>}, {transform_indices = @transform_2, window_bounds = array<i64: 1, 16, 128>}, {transform_indices = @transform_3, window_bounds = array<i64: 1, 1, 16>}, {transform_indices = @transform_4, window_bounds = array<i64: 1, 16, 128>}]} {
    %c0 = arith.constant 0 : index
    %c0_0 = arith.constant 0 : index
    %c0_1 = arith.constant 0 : index
    %0 = vector.load %arg1[%c0, %c0_0, %c0_1] : memref<1x16x128xf32, #tpu.memory_space<vmem>>, vector<1x16x128xf32>
    %1 = vector.shape_cast %0 : vector<1x16x128xf32> to vector<16x128xf32>
    %c0_2 = arith.constant 0 : index
    %c0_3 = arith.constant 0 : index
    %c0_4 = arith.constant 0 : index
    %2 = vector.load %arg2[%c0_2, %c0_3, %c0_4] : memref<1x16x128xf32, #tpu.memory_space<vmem>>, vector<1x16x128xf32>
    %3 = vector.shape_cast %2 : vector<1x16x128xf32> to vector<16x128xf32>
    %c0_5 = arith.constant 0 : index
    %c0_6 = arith.constant 0 : index
    %c0_7 = arith.constant 0 : index
    %4 = vector.load %arg3[%c0_5, %c0_6, %c0_7] : memref<1x16x128xf32, #tpu.memory_space<vmem>>, vector<1x16x128xf32>
    %5 = vector.shape_cast %4 : vector<1x16x128xf32> to vector<16x128xf32>
    %c0_8 = arith.constant 0 : index
    %c0_9 = arith.constant 0 : index
    %c0_10 = arith.constant 0 : index
    %6 = vector.load %arg4[%c0_8, %c0_9, %c0_10] : memref<1x1x16xf32, #tpu.memory_space<vmem>>, vector<1x1x16xf32>
    %7 = vector.shape_cast %6 : vector<1x1x16xf32> to vector<1x16xf32>
    %8 = tpu.iota {dimensions = array<i32: 0>} : vector<16x16xi32>
    %9 = tpu.iota {dimensions = array<i32: 1>} : vector<16x16xi32>
    %10 = arith.cmpi sle, %9, %8 : vector<16x16xi32>
    %cst = arith.constant 5.000000e-01 : f32
    %11 = vector.broadcast %cst : f32 to vector<1x16xf32>
    %12 = arith.cmpf ogt, %7, %11 : vector<1x16xf32>
    %13 = vector.broadcast %12 : vector<1x16xi1> to vector<16x16xi1>
    %14 = arith.andi %10, %13 : vector<16x16xi1>
    %15 = vector.extract_strided_slice %1 {offsets = [0, 0], sizes = [16, 32], strides = [1, 1]} : vector<16x128xf32> to vector<16x32xf32>
    %16 = arith.truncf %15 : vector<16x32xf32> to vector<16x32xbf16>
    %17 = vector.extract_strided_slice %3 {offsets = [0, 0], sizes = [16, 32], strides = [1, 1]} : vector<16x128xf32> to vector<16x32xf32>
    %18 = arith.truncf %17 : vector<16x32xf32> to vector<16x32xbf16>
    %19 = vector.extract_strided_slice %5 {offsets = [0, 0], sizes = [16, 32], strides = [1, 1]} : vector<16x128xf32> to vector<16x32xf32>
    %20 = arith.truncf %19 : vector<16x32xf32> to vector<16x32xbf16>
    %cst_11 = arith.constant dense<0.000000e+00> : vector<16x16xf32>
    %21 = tpu.matmul %16, %18, %cst_11 {dimension_numbers = #tpu.dot_dimension_numbers<[1], [1], [0], [0], [0, 0, 1, 0], [], []>} : vector<16x32xbf16>, vector<16x32xbf16>, vector<16x16xf32> -> vector<16x16xf32>
    %cst_12 = arith.constant 0.176776692 : f32
    %22 = vector.broadcast %cst_12 : f32 to vector<16x16xf32>
    %23 = arith.mulf %21, %22 : vector<16x16xf32>
    %cst_13 = arith.constant -1.000000e+30 : f32
    %24 = vector.broadcast %cst_13 : f32 to vector<16x16xf32>
    %25 = arith.select %14, %23, %24 : vector<16x16xi1>, vector<16x16xf32>
    %cst_14 = arith.constant dense<0xFF800000> : vector<16xf32>
    %26 = vector.multi_reduction <maximumf>, %25, %cst_14 [1] : vector<16x16xf32> to vector<16xf32>
    %27 = vector.shape_cast %26 : vector<16xf32> to vector<16x1xf32>
    %28 = vector.broadcast %27 : vector<16x1xf32> to vector<16x16xf32>
    %29 = arith.subf %25, %28 : vector<16x16xf32>
    %30 = math.exp %29 : vector<16x16xf32>
    %cst_15 = arith.constant dense<0.000000e+00> : vector<16xf32>
    %31 = vector.multi_reduction <add>, %30, %cst_15 [1] : vector<16x16xf32> to vector<16xf32>
    %32 = vector.shape_cast %31 : vector<16xf32> to vector<16x1xf32>
    %33 = tpu.reciprocal %32 {approx = true} : vector<16x1xf32> -> vector<16x1xf32>
    %34 = vector.broadcast %33 : vector<16x1xf32> to vector<16x16xf32>
    %35 = arith.mulf %30, %34 : vector<16x16xf32>
    %36 = arith.truncf %35 : vector<16x16xf32> to vector<16x16xbf16>
    %cst_16 = arith.constant dense<0.000000e+00> : vector<16x32xf32>
    %37 = tpu.matmul %36, %20, %cst_16 {dimension_numbers = #tpu.dot_dimension_numbers<[1], [0], [0], [1], [0, 0, 1, 1], [], []>} : vector<16x16xbf16>, vector<16x32xbf16>, vector<16x32xf32> -> vector<16x32xf32>
    %c0_17 = arith.constant 0 : index
    %c0_18 = arith.constant 0 : index
    %c0_19 = arith.constant 0 : index
    %38 = vector.load %arg5[%c0_17, %c0_18, %c0_19] : memref<1x16x128xf32, #tpu.memory_space<vmem>>, vector<1x16x32xf32>
    %39 = vector.shape_cast %38 : vector<1x16x32xf32> to vector<16x32xf32>
    %40 = vector.shape_cast %37 : vector<16x32xf32> to vector<1x16x32xf32>
    tpu.vector_store %arg5[%c0_17, %c0_18, %c0_19], %40 {strides = array<i32>} : memref<1x16x128xf32, #tpu.memory_space<vmem>>, vector<1x16x32xf32>,
    %41 = vector.extract_strided_slice %1 {offsets = [0, 32], sizes = [16, 32], strides = [1, 1]} : vector<16x128xf32> to vector<16x32xf32>
    %42 = arith.truncf %41 : vector<16x32xf32> to vector<16x32xbf16>
    %43 = vector.extract_strided_slice %3 {offsets = [0, 32], sizes = [16, 32], strides = [1, 1]} : vector<16x128xf32> to vector<16x32xf32>
    %44 = arith.truncf %43 : vector<16x32xf32> to vector<16x32xbf16>
    %45 = vector.extract_strided_slice %5 {offsets = [0, 32], sizes = [16, 32], strides = [1, 1]} : vector<16x128xf32> to vector<16x32xf32>
    %46 = arith.truncf %45 : vector<16x32xf32> to vector<16x32xbf16>
    %cst_20 = arith.constant dense<0.000000e+00> : vector<16x16xf32>
    %47 = tpu.matmul %42, %44, %cst_20 {dimension_numbers = #tpu.dot_dimension_numbers<[1], [1], [0], [0], [0, 0, 1, 0], [], []>} : vector<16x32xbf16>, vector<16x32xbf16>, vector<16x16xf32> -> vector<16x16xf32>
    %cst_21 = arith.constant 0.176776692 : f32
    %48 = vector.broadcast %cst_21 : f32 to vector<16x16xf32>
    %49 = arith.mulf %47, %48 : vector<16x16xf32>
    %cst_22 = arith.constant -1.000000e+30 : f32
    %50 = vector.broadcast %cst_22 : f32 to vector<16x16xf32>
    %51 = arith.select %14, %49, %50 : vector<16x16xi1>, vector<16x16xf32>
    %cst_23 = arith.constant dense<0xFF800000> : vector<16xf32>
    %52 = vector.multi_reduction <maximumf>, %51, %cst_23 [1] : vector<16x16xf32> to vector<16xf32>
    %53 = vector.shape_cast %52 : vector<16xf32> to vector<16x1xf32>
    %54 = vector.broadcast %53 : vector<16x1xf32> to vector<16x16xf32>
    %55 = arith.subf %51, %54 : vector<16x16xf32>
    %56 = math.exp %55 : vector<16x16xf32>
    %cst_24 = arith.constant dense<0.000000e+00> : vector<16xf32>
    %57 = vector.multi_reduction <add>, %56, %cst_24 [1] : vector<16x16xf32> to vector<16xf32>
    %58 = vector.shape_cast %57 : vector<16xf32> to vector<16x1xf32>
    %59 = tpu.reciprocal %58 {approx = true} : vector<16x1xf32> -> vector<16x1xf32>
    %60 = vector.broadcast %59 : vector<16x1xf32> to vector<16x16xf32>
    %61 = arith.mulf %56, %60 : vector<16x16xf32>
    %62 = arith.truncf %61 : vector<16x16xf32> to vector<16x16xbf16>
    %cst_25 = arith.constant dense<0.000000e+00> : vector<16x32xf32>
    %63 = tpu.matmul %62, %46, %cst_25 {dimension_numbers = #tpu.dot_dimension_numbers<[1], [0], [0], [1], [0, 0, 1, 1], [], []>} : vector<16x16xbf16>, vector<16x32xbf16>, vector<16x32xf32> -> vector<16x32xf32>
    %c0_26 = arith.constant 0 : index
    %c0_27 = arith.constant 0 : index
    %c32 = arith.constant 32 : index
    %64 = vector.load %arg5[%c0_26, %c0_27, %c32] : memref<1x16x128xf32, #tpu.memory_space<vmem>>, vector<1x16x32xf32>
    %65 = vector.shape_cast %64 : vector<1x16x32xf32> to vector<16x32xf32>
    %66 = vector.shape_cast %63 : vector<16x32xf32> to vector<1x16x32xf32>
    tpu.vector_store %arg5[%c0_26, %c0_27, %c32], %66 {strides = array<i32>} : memref<1x16x128xf32, #tpu.memory_space<vmem>>, vector<1x16x32xf32>,
    %67 = vector.extract_strided_slice %1 {offsets = [0, 64], sizes = [16, 32], strides = [1, 1]} : vector<16x128xf32> to vector<16x32xf32>
    %68 = arith.truncf %67 : vector<16x32xf32> to vector<16x32xbf16>
    %69 = vector.extract_strided_slice %3 {offsets = [0, 64], sizes = [16, 32], strides = [1, 1]} : vector<16x128xf32> to vector<16x32xf32>
    %70 = arith.truncf %69 : vector<16x32xf32> to vector<16x32xbf16>
    %71 = vector.extract_strided_slice %5 {offsets = [0, 64], sizes = [16, 32], strides = [1, 1]} : vector<16x128xf32> to vector<16x32xf32>
    %72 = arith.truncf %71 : vector<16x32xf32> to vector<16x32xbf16>
    %cst_28 = arith.constant dense<0.000000e+00> : vector<16x16xf32>
    %73 = tpu.matmul %68, %70, %cst_28 {dimension_numbers = #tpu.dot_dimension_numbers<[1], [1], [0], [0], [0, 0, 1, 0], [], []>} : vector<16x32xbf16>, vector<16x32xbf16>, vector<16x16xf32> -> vector<16x16xf32>
    %cst_29 = arith.constant 0.176776692 : f32
    %74 = vector.broadcast %cst_29 : f32 to vector<16x16xf32>
    %75 = arith.mulf %73, %74 : vector<16x16xf32>
    %cst_30 = arith.constant -1.000000e+30 : f32
    %76 = vector.broadcast %cst_30 : f32 to vector<16x16xf32>
    %77 = arith.select %14, %75, %76 : vector<16x16xi1>, vector<16x16xf32>
    %cst_31 = arith.constant dense<0xFF800000> : vector<16xf32>
    %78 = vector.multi_reduction <maximumf>, %77, %cst_31 [1] : vector<16x16xf32> to vector<16xf32>
    %79 = vector.shape_cast %78 : vector<16xf32> to vector<16x1xf32>
    %80 = vector.broadcast %79 : vector<16x1xf32> to vector<16x16xf32>
    %81 = arith.subf %77, %80 : vector<16x16xf32>
    %82 = math.exp %81 : vector<16x16xf32>
    %cst_32 = arith.constant dense<0.000000e+00> : vector<16xf32>
    %83 = vector.multi_reduction <add>, %82, %cst_32 [1] : vector<16x16xf32> to vector<16xf32>
    %84 = vector.shape_cast %83 : vector<16xf32> to vector<16x1xf32>
    %85 = tpu.reciprocal %84 {approx = true} : vector<16x1xf32> -> vector<16x1xf32>
    %86 = vector.broadcast %85 : vector<16x1xf32> to vector<16x16xf32>
    %87 = arith.mulf %82, %86 : vector<16x16xf32>
    %88 = arith.truncf %87 : vector<16x16xf32> to vector<16x16xbf16>
    %cst_33 = arith.constant dense<0.000000e+00> : vector<16x32xf32>
    %89 = tpu.matmul %88, %72, %cst_33 {dimension_numbers = #tpu.dot_dimension_numbers<[1], [0], [0], [1], [0, 0, 1, 1], [], []>} : vector<16x16xbf16>, vector<16x32xbf16>, vector<16x32xf32> -> vector<16x32xf32>
    %c0_34 = arith.constant 0 : index
    %c0_35 = arith.constant 0 : index
    %c64 = arith.constant 64 : index
    %90 = vector.load %arg5[%c0_34, %c0_35, %c64] : memref<1x16x128xf32, #tpu.memory_space<vmem>>, vector<1x16x32xf32>
    %91 = vector.shape_cast %90 : vector<1x16x32xf32> to vector<16x32xf32>
    %92 = vector.shape_cast %89 : vector<16x32xf32> to vector<1x16x32xf32>
    tpu.vector_store %arg5[%c0_34, %c0_35, %c64], %92 {strides = array<i32>} : memref<1x16x128xf32, #tpu.memory_space<vmem>>, vector<1x16x32xf32>,
    %93 = vector.extract_strided_slice %1 {offsets = [0, 96], sizes = [16, 32], strides = [1, 1]} : vector<16x128xf32> to vector<16x32xf32>
    %94 = arith.truncf %93 : vector<16x32xf32> to vector<16x32xbf16>
    %95 = vector.extract_strided_slice %3 {offsets = [0, 96], sizes = [16, 32], strides = [1, 1]} : vector<16x128xf32> to vector<16x32xf32>
    %96 = arith.truncf %95 : vector<16x32xf32> to vector<16x32xbf16>
    %97 = vector.extract_strided_slice %5 {offsets = [0, 96], sizes = [16, 32], strides = [1, 1]} : vector<16x128xf32> to vector<16x32xf32>
    %98 = arith.truncf %97 : vector<16x32xf32> to vector<16x32xbf16>
    %cst_36 = arith.constant dense<0.000000e+00> : vector<16x16xf32>
    %99 = tpu.matmul %94, %96, %cst_36 {dimension_numbers = #tpu.dot_dimension_numbers<[1], [1], [0], [0], [0, 0, 1, 0], [], []>} : vector<16x32xbf16>, vector<16x32xbf16>, vector<16x16xf32> -> vector<16x16xf32>
    %cst_37 = arith.constant 0.176776692 : f32
    %100 = vector.broadcast %cst_37 : f32 to vector<16x16xf32>
    %101 = arith.mulf %99, %100 : vector<16x16xf32>
    %cst_38 = arith.constant -1.000000e+30 : f32
    %102 = vector.broadcast %cst_38 : f32 to vector<16x16xf32>
    %103 = arith.select %14, %101, %102 : vector<16x16xi1>, vector<16x16xf32>
    %cst_39 = arith.constant dense<0xFF800000> : vector<16xf32>
    %104 = vector.multi_reduction <maximumf>, %103, %cst_39 [1] : vector<16x16xf32> to vector<16xf32>
    %105 = vector.shape_cast %104 : vector<16xf32> to vector<16x1xf32>
    %106 = vector.broadcast %105 : vector<16x1xf32> to vector<16x16xf32>
    %107 = arith.subf %103, %106 : vector<16x16xf32>
    %108 = math.exp %107 : vector<16x16xf32>
    %cst_40 = arith.constant dense<0.000000e+00> : vector<16xf32>
    %109 = vector.multi_reduction <add>, %108, %cst_40 [1] : vector<16x16xf32> to vector<16xf32>
    %110 = vector.shape_cast %109 : vector<16xf32> to vector<16x1xf32>
    %111 = tpu.reciprocal %110 {approx = true} : vector<16x1xf32> -> vector<16x1xf32>
    %112 = vector.broadcast %111 : vector<16x1xf32> to vector<16x16xf32>
    %113 = arith.mulf %108, %112 : vector<16x16xf32>
    %114 = arith.truncf %113 : vector<16x16xf32> to vector<16x16xbf16>
    %cst_41 = arith.constant dense<0.000000e+00> : vector<16x32xf32>
    %115 = tpu.matmul %114, %98, %cst_41 {dimension_numbers = #tpu.dot_dimension_numbers<[1], [0], [0], [1], [0, 0, 1, 1], [], []>} : vector<16x16xbf16>, vector<16x32xbf16>, vector<16x32xf32> -> vector<16x32xf32>
    %c0_42 = arith.constant 0 : index
    %c0_43 = arith.constant 0 : index
    %c96 = arith.constant 96 : index
    %116 = vector.load %arg5[%c0_42, %c0_43, %c96] : memref<1x16x128xf32, #tpu.memory_space<vmem>>, vector<1x16x32xf32>
    %117 = vector.shape_cast %116 : vector<1x16x32xf32> to vector<16x32xf32>
    %118 = vector.shape_cast %115 : vector<16x32xf32> to vector<1x16x32xf32>
    tpu.vector_store %arg5[%c0_42, %c0_43, %c96], %118 {strides = array<i32>} : memref<1x16x128xf32, #tpu.memory_space<vmem>>, vector<1x16x32xf32>,
    return
  }
  func.func @transform_0(%arg0: i32) -> (i32, i32, i32) {
    %c0_i32 = arith.constant 0 : i32
    %c0_i32_0 = arith.constant 0 : i32
    %c0_i32_1 = arith.constant 0 : i32
    return %arg0, %c0_i32, %c0_i32_0 : i32, i32, i32
  }
  func.func @transform_1(%arg0: i32) -> (i32, i32, i32) {
    %c0_i32 = arith.constant 0 : i32
    %c0_i32_0 = arith.constant 0 : i32
    %c0_i32_1 = arith.constant 0 : i32
    return %arg0, %c0_i32, %c0_i32_0 : i32, i32, i32
  }
  func.func @transform_2(%arg0: i32) -> (i32, i32, i32) {
    %c0_i32 = arith.constant 0 : i32
    %c0_i32_0 = arith.constant 0 : i32
    %c0_i32_1 = arith.constant 0 : i32
    return %arg0, %c0_i32, %c0_i32_0 : i32, i32, i32
  }
  func.func @transform_3(%arg0: i32) -> (i32, i32, i32) {
    %c0_i32 = arith.constant 0 : i32
    %c0_i32_0 = arith.constant 0 : i32
    %c0_i32_1 = arith.constant 0 : i32
    return %arg0, %c0_i32, %c0_i32_0 : i32, i32, i32
  }
  func.func @transform_4(%arg0: i32) -> (i32, i32, i32) {
    %c0_i32 = arith.constant 0 : i32
    %c0_i32_0 = arith.constant 0 : i32
    %c0_i32_1 = arith.constant 0 : i32
    return %arg0, %c0_i32, %c0_i32_0 : i32, i32, i32
  }
}

module attributes {stable_mosaic.version = 11 : i64} {
  func.func @_matmul_residual_kernel(%arg0: memref<32x128xf32, #tpu.memory_space<vmem>>, %arg1: memref<128x128xbf16, #tpu.memory_space<vmem>>, %arg2: memref<32x128xf32, #tpu.memory_space<vmem>>, %arg3: memref<32x128xf32, #tpu.memory_space<vmem>>) attributes {dimension_semantics = [], scalar_prefetch = 0 : i64, scratch_operands = 0 : i64, tpu.core_type = #tpu.core_type<tc>} {
    %c0 = arith.constant 0 : index
    %c0_0 = arith.constant 0 : index
    %0 = vector.load %arg0[%c0, %c0_0] : memref<32x128xf32, #tpu.memory_space<vmem>>, vector<32x128xf32>
    %1 = arith.truncf %0 : vector<32x128xf32> to vector<32x128xbf16>
    %c0_1 = arith.constant 0 : index
    %c0_2 = arith.constant 0 : index
    %2 = vector.load %arg2[%c0_1, %c0_2] : memref<32x128xf32, #tpu.memory_space<vmem>>, vector<32x128xf32>
    %c0_3 = arith.constant 0 : index
    %c0_4 = arith.constant 0 : index
    %3 = vector.load %arg1[%c0_3, %c0_4] : memref<128x128xbf16, #tpu.memory_space<vmem>>, vector<128x128xbf16>
    %cst = arith.constant dense<0.000000e+00> : vector<32x128xf32>
    %4 = tpu.matmul %1, %3, %cst {dimension_numbers = #tpu.dot_dimension_numbers<[1], [0], [0], [1], [0, 0, 1, 1], [], []>} : vector<32x128xbf16>, vector<128x128xbf16>, vector<32x128xf32> -> vector<32x128xf32>
    %5 = arith.addf %2, %4 : vector<32x128xf32>
    %c0_5 = arith.constant 0 : index
    %c0_6 = arith.constant 0 : index
    %6 = vector.load %arg3[%c0_5, %c0_6] : memref<32x128xf32, #tpu.memory_space<vmem>>, vector<32x128xf32>
    tpu.vector_store %arg3[%c0_5, %c0_6], %5 {strides = array<i32>} : memref<32x128xf32, #tpu.memory_space<vmem>>, vector<32x128xf32>,
    return
  }
}

module attributes {stable_mosaic.version = 11 : i64} {
  func.func @_mlp_kernel(%arg0: memref<32x128xf32, #tpu.memory_space<vmem>>, %arg1: memref<1x128xf32, #tpu.memory_space<vmem>>, %arg2: memref<128x512xbf16, #tpu.memory_space<vmem>>, %arg3: memref<256x128xbf16, #tpu.memory_space<vmem>>, %arg4: memref<32x128xf32, #tpu.memory_space<vmem>>) attributes {dimension_semantics = [], scalar_prefetch = 0 : i64, scratch_operands = 0 : i64, tpu.core_type = #tpu.core_type<tc>} {
    %c0 = arith.constant 0 : index
    %c0_0 = arith.constant 0 : index
    %0 = vector.load %arg0[%c0, %c0_0] : memref<32x128xf32, #tpu.memory_space<vmem>>, vector<32x128xf32>
    %1 = arith.mulf %0, %0 : vector<32x128xf32>
    %cst = arith.constant dense<0.000000e+00> : vector<32xf32>
    %2 = vector.multi_reduction <add>, %1, %cst [1] : vector<32x128xf32> to vector<32xf32>
    %3 = vector.shape_cast %2 : vector<32xf32> to vector<32x1xf32>
    %cst_1 = arith.constant 1.280000e+02 : f32
    %4 = vector.broadcast %cst_1 : f32 to vector<32x1xf32>
    %5 = arith.divf %3, %4 : vector<32x1xf32>
    %cst_2 = arith.constant 9.99999997E-7 : f32
    %6 = vector.broadcast %cst_2 : f32 to vector<32x1xf32>
    %7 = arith.addf %5, %6 : vector<32x1xf32>
    %8 = math.rsqrt %7 : vector<32x1xf32>
    %9 = vector.broadcast %8 : vector<32x1xf32> to vector<32x128xf32>
    %10 = arith.mulf %0, %9 : vector<32x128xf32>
    %c0_3 = arith.constant 0 : index
    %c0_4 = arith.constant 0 : index
    %11 = vector.load %arg1[%c0_3, %c0_4] : memref<1x128xf32, #tpu.memory_space<vmem>>, vector<1x128xf32>
    %12 = vector.broadcast %11 : vector<1x128xf32> to vector<32x128xf32>
    %13 = arith.mulf %10, %12 : vector<32x128xf32>
    %14 = arith.truncf %13 : vector<32x128xf32> to vector<32x128xbf16>
    %c0_5 = arith.constant 0 : index
    %c0_6 = arith.constant 0 : index
    %15 = vector.load %arg2[%c0_5, %c0_6] : memref<128x512xbf16, #tpu.memory_space<vmem>>, vector<128x512xbf16>
    %cst_7 = arith.constant dense<0.000000e+00> : vector<32x512xf32>
    %16 = tpu.matmul %14, %15, %cst_7 {dimension_numbers = #tpu.dot_dimension_numbers<[1], [0], [0], [1], [0, 0, 1, 1], [], []>} : vector<32x128xbf16>, vector<128x512xbf16>, vector<32x512xf32> -> vector<32x512xf32>
    %17 = vector.extract_strided_slice %16 {offsets = [0, 0], sizes = [32, 256], strides = [1, 1]} : vector<32x512xf32> to vector<32x256xf32>
    %18 = vector.extract_strided_slice %16 {offsets = [0, 256], sizes = [32, 256], strides = [1, 1]} : vector<32x512xf32> to vector<32x256xf32>
    %19 = arith.negf %17 : vector<32x256xf32>
    %20 = math.exp %19 : vector<32x256xf32>
    %cst_8 = arith.constant 1.000000e+00 : f32
    %21 = vector.broadcast %cst_8 : f32 to vector<32x256xf32>
    %22 = arith.addf %21, %20 : vector<32x256xf32>
    %23 = arith.divf %21, %22 : vector<32x256xf32>
    %24 = arith.mulf %17, %23 : vector<32x256xf32>
    %25 = arith.mulf %24, %18 : vector<32x256xf32>
    %26 = arith.truncf %25 : vector<32x256xf32> to vector<32x256xbf16>
    %c0_9 = arith.constant 0 : index
    %c0_10 = arith.constant 0 : index
    %27 = vector.load %arg3[%c0_9, %c0_10] : memref<256x128xbf16, #tpu.memory_space<vmem>>, vector<256x128xbf16>
    %cst_11 = arith.constant dense<0.000000e+00> : vector<32x128xf32>
    %28 = tpu.matmul %26, %27, %cst_11 {dimension_numbers = #tpu.dot_dimension_numbers<[1], [0], [0], [1], [0, 0, 1, 1], [], []>} : vector<32x256xbf16>, vector<256x128xbf16>, vector<32x128xf32> -> vector<32x128xf32>
    %29 = arith.addf %0, %28 : vector<32x128xf32>
    %c0_12 = arith.constant 0 : index
    %c0_13 = arith.constant 0 : index
    %30 = vector.load %arg4[%c0_12, %c0_13] : memref<32x128xf32, #tpu.memory_space<vmem>>, vector<32x128xf32>
    tpu.vector_store %arg4[%c0_12, %c0_13], %29 {strides = array<i32>} : memref<32x128xf32, #tpu.memory_space<vmem>>, vector<32x128xf32>,
    return
  }
}

module attributes {stable_mosaic.version = 11 : i64} {
  func.func @_head_ce_kernel(%arg0: memref<32x128xf32, #tpu.memory_space<vmem>>, %arg1: memref<1x128xf32, #tpu.memory_space<vmem>>, %arg2: memref<128x256xbf16, #tpu.memory_space<vmem>>, %arg3: memref<32x1xi32, #tpu.memory_space<vmem>>, %arg4: memref<32x256xf32, #tpu.memory_space<vmem>>, %arg5: memref<32x1xf32, #tpu.memory_space<vmem>>, %arg6: memref<32x1xf32, #tpu.memory_space<vmem>>) attributes {dimension_semantics = [], scalar_prefetch = 0 : i64, scratch_operands = 0 : i64, tpu.core_type = #tpu.core_type<tc>} {
    %c0 = arith.constant 0 : index
    %c0_0 = arith.constant 0 : index
    %0 = vector.load %arg0[%c0, %c0_0] : memref<32x128xf32, #tpu.memory_space<vmem>>, vector<32x128xf32>
    %1 = arith.mulf %0, %0 : vector<32x128xf32>
    %cst = arith.constant dense<0.000000e+00> : vector<32xf32>
    %2 = vector.multi_reduction <add>, %1, %cst [1] : vector<32x128xf32> to vector<32xf32>
    %3 = vector.shape_cast %2 : vector<32xf32> to vector<32x1xf32>
    %cst_1 = arith.constant 1.280000e+02 : f32
    %4 = vector.broadcast %cst_1 : f32 to vector<32x1xf32>
    %5 = arith.divf %3, %4 : vector<32x1xf32>
    %cst_2 = arith.constant 9.99999997E-7 : f32
    %6 = vector.broadcast %cst_2 : f32 to vector<32x1xf32>
    %7 = arith.addf %5, %6 : vector<32x1xf32>
    %8 = math.rsqrt %7 : vector<32x1xf32>
    %9 = vector.broadcast %8 : vector<32x1xf32> to vector<32x128xf32>
    %10 = arith.mulf %0, %9 : vector<32x128xf32>
    %c0_3 = arith.constant 0 : index
    %c0_4 = arith.constant 0 : index
    %11 = vector.load %arg1[%c0_3, %c0_4] : memref<1x128xf32, #tpu.memory_space<vmem>>, vector<1x128xf32>
    %12 = vector.broadcast %11 : vector<1x128xf32> to vector<32x128xf32>
    %13 = arith.mulf %10, %12 : vector<32x128xf32>
    %14 = arith.truncf %13 : vector<32x128xf32> to vector<32x128xbf16>
    %c0_5 = arith.constant 0 : index
    %c0_6 = arith.constant 0 : index
    %15 = vector.load %arg2[%c0_5, %c0_6] : memref<128x256xbf16, #tpu.memory_space<vmem>>, vector<128x256xbf16>
    %cst_7 = arith.constant dense<0.000000e+00> : vector<32x256xf32>
    %16 = tpu.matmul %14, %15, %cst_7 {dimension_numbers = #tpu.dot_dimension_numbers<[1], [0], [0], [1], [0, 0, 1, 1], [], []>} : vector<32x128xbf16>, vector<128x256xbf16>, vector<32x256xf32> -> vector<32x256xf32>
    %c0_8 = arith.constant 0 : index
    %c0_9 = arith.constant 0 : index
    %17 = vector.load %arg4[%c0_8, %c0_9] : memref<32x256xf32, #tpu.memory_space<vmem>>, vector<32x256xf32>
    tpu.vector_store %arg4[%c0_8, %c0_9], %16 {strides = array<i32>} : memref<32x256xf32, #tpu.memory_space<vmem>>, vector<32x256xf32>,
    %c0_10 = arith.constant 0 : index
    %c0_11 = arith.constant 0 : index
    %18 = vector.load %arg3[%c0_10, %c0_11] : memref<32x1xi32, #tpu.memory_space<vmem>>, vector<32x1xi32>
    %cst_12 = arith.constant dense<0xFF800000> : vector<32xf32>
    %19 = vector.multi_reduction <maximumf>, %16, %cst_12 [1] : vector<32x256xf32> to vector<32xf32>
    %20 = vector.shape_cast %19 : vector<32xf32> to vector<32x1xf32>
    %21 = vector.broadcast %20 : vector<32x1xf32> to vector<32x256xf32>
    %22 = arith.subf %16, %21 : vector<32x256xf32>
    %23 = math.exp %22 : vector<32x256xf32>
    %cst_13 = arith.constant dense<0.000000e+00> : vector<32xf32>
    %24 = vector.multi_reduction <add>, %23, %cst_13 [1] : vector<32x256xf32> to vector<32xf32>
    %25 = vector.shape_cast %24 : vector<32xf32> to vector<32x1xf32>
    %26 = math.log %25 : vector<32x1xf32>
    %27 = arith.addf %20, %26 : vector<32x1xf32>
    %28 = tpu.iota {dimensions = array<i32: 1>} : vector<32x256xi32>
    %29 = vector.broadcast %18 : vector<32x1xi32> to vector<32x256xi32>
    %30 = arith.cmpi eq, %28, %29 : vector<32x256xi32>
    %cst_14 = arith.constant 0.000000e+00 : f32
    %31 = vector.broadcast %cst_14 : f32 to vector<32x256xf32>
    %32 = arith.select %30, %16, %31 : vector<32x256xi1>, vector<32x256xf32>
    %cst_15 = arith.constant dense<0.000000e+00> : vector<32xf32>
    %33 = vector.multi_reduction <add>, %32, %cst_15 [1] : vector<32x256xf32> to vector<32xf32>
    %34 = vector.shape_cast %33 : vector<32xf32> to vector<32x1xf32>
    %c-100_i32 = arith.constant -100 : i32
    %35 = vector.broadcast %c-100_i32 : i32 to vector<32x1xi32>
    %36 = arith.cmpi ne, %18, %35 : vector<32x1xi32>
    %37 = arith.extui %36 : vector<32x1xi1> to vector<32x1xi32>
    %38 = arith.sitofp %37 : vector<32x1xi32> to vector<32x1xf32>
    %39 = arith.subf %27, %34 : vector<32x1xf32>
    %40 = arith.mulf %39, %38 : vector<32x1xf32>
    %c0_16 = arith.constant 0 : index
    %c0_17 = arith.constant 0 : index
    %41 = vector.load %arg5[%c0_16, %c0_17] : memref<32x1xf32, #tpu.memory_space<vmem>>, vector<32x1xf32>
    tpu.vector_store %arg5[%c0_16, %c0_17], %40 {strides = array<i32>} : memref<32x1xf32, #tpu.memory_space<vmem>>, vector<32x1xf32>,
    %c0_18 = arith.constant 0 : index
    %c0_19 = arith.constant 0 : index
    %42 = vector.load %arg6[%c0_18, %c0_19] : memref<32x1xf32, #tpu.memory_space<vmem>>, vector<32x1xf32>
    tpu.vector_store %arg6[%c0_18, %c0_19], %38 {strides = array<i32>} : memref<32x1xf32, #tpu.memory_space<vmem>>, vector<32x1xf32>,
    return
  }
}

</mosaic_0001>

<bundles_post_ra>
// kernel: multimodal_forward.8
= control target key start
LH: loop header
LB: loop body
LE: loop exit
PB: predicated region body
PF: predicated region fallthrough
CT: control target
= control target key end

     0   :  { %vm54_vm0 = vcmask 523264   ;;  %s147_s1 = inlined_call_operand.vmem [shape: bf16[64,128], index: 1, kind: input, shape index: {}]   ;;  %s148_s2 = inlined_call_operand.vmem [shape: f32[1,128], index: 2, kind: input, shape index: {}]   ;;  %s149_s0 = inlined_call_operand.vmem [shape: f32[10,64], index: 0, kind: input, shape index: {}]   ;;  %s150_s3 = inlined_call_operand.vmem [shape: f32[10,128], index: 3, kind: output, shape index: {}]  }
   0x1   :  { %v98_v0 = vld [vmem:[%s147_s1 + $0x18] sm:$0xff]  ;;  %v97_v1 = vld [vmem:[%s147_s1 + $0x10] sm:$0xff]  ;;  %v96_v2 = vld [vmem:[%s147_s1 + $0x8] sm:$0xff] }
   0x2   :  { %62 = vmatpush.bf16.msra.mxu0 %v98_v0  ;;  %v95_v3 = vld [vmem:[%s147_s1] sm:$0xff]  ;;  %v16_v5 = vld [vmem:[%s149_s0 + $0x8] sm:$0x3] }
   0x3   :  { %v15_v4 = vld [vmem:[%s149_s0] sm:$0xff] }
   0x4   :  { %v17_v6 = vpack.c.bf16 %v16_v5, %v15_v4  ;;  %v99_v7 = vld [vmem:[%s148_s2] ss:$0 sm:$0xff] }
   0x6   :  { %63 = vmatpush.bf16.msra.mxu0 %v97_v1 }
   0xa   :  { %64 = vmatpush.bf16.msra.mxu0 %v96_v2 }
   0xe   :  { %65 = vmatpush.bf16.msra.mxu0 %v95_v3 }
  0x11   :  { %94 = vmatmul.msk.bf16.vlgmr.msra.gmra.mxu0 %vm54_vm0, %v17_v6 }
  0x8e   :  { %v67_v8 = vpop.f32.mrf.mxu0 }
  0x8f   :  { %v68_v9 = vadd.f32 %v99_v7, %v67_v8 }
  0x91   :  { %72 = vst [vmem:[%s150_s3] sm:$0xff] %v68_v9 }
  0x96   :  { %v69_v10 = vpop.f32.mrf.mxu0 }
  0x97   :  { %v70_v11 = vadd.f32 %v99_v7, %v69_v10 }
  0x99   :  { %73 = vst [vmem:[%s150_s3 + $0x8] sm:$0x3] %v70_v11 }

// kernel: multimodal_forward.7
= control target key start
LH: loop header
LB: loop body
LE: loop exit
PB: predicated region body
PF: predicated region fallthrough
CT: control target
= control target key end

     0   :  { %vm492_vm0 = vcmask 523264   ;;  %s927_s1 = inlined_call_operand.vmem [shape: bf16[768,64], index: 1, kind: input, shape index: {}]   ;;  %s928_s2 = inlined_call_operand.vmem [shape: f32[1,64], index: 2, kind: input, shape index: {}]   ;;  %s929_s0 = inlined_call_operand.vmem [shape: f32[8,768], index: 0, kind: input, shape index: {}]   ;;  %s930_s3 = inlined_call_operand.vmem [shape: f32[8,64], index: 3, kind: output, shape index: {}]  }
   0x1   :  { %v697_v0 = vld [vmem:[%s927_s1 + $0x38] sm:$0xff]  ;;  %v696_v2 = vld [vmem:[%s927_s1 + $0x30] sm:$0xff]  ;;  %v695_v8 = vld [vmem:[%s927_s1 + $0x28] sm:$0xff] }
   0x2   :  { %v705_v1 = vld [vmem:[%s927_s1 + $0x78] sm:$0xff]  ;;  %414 = vmatpush.bf16.msra.mxu0 %v697_v0  ;;  %v704_v3 = vld [vmem:[%s927_s1 + $0x70] sm:$0xff]  ;;  %v703_v9 = vld [vmem:[%s927_s1 + $0x68] sm:$0xff] }
   0x3   :  { %427 = vmatpush.bf16.msra.mxu1 %v705_v1  ;;  %v713_v4 = vld [vmem:[%s927_s1 + $0xb8] sm:$0xff]  ;;  %v712_v6 = vld [vmem:[%s927_s1 + $0xb0] sm:$0xff]  ;;  %v711_v10 = vld [vmem:[%s927_s1 + $0xa8] sm:$0xff] }
   0x4   :  { %v721_v5 = vld [vmem:[%s927_s1 + $0xf8] sm:$0xff]  ;;  %440 = vmatpush.bf16.msra.mxu2 %v713_v4  ;;  %v720_v7 = vld [vmem:[%s927_s1 + $0xf0] sm:$0xff]  ;;  %v719_v11 = vld [vmem:[%s927_s1 + $0xe8] sm:$0xff] }
   0x5   :  { %453 = vmatpush.bf16.msra.mxu3 %v721_v5  ;;  %v694_v12 = vld [vmem:[%s927_s1 + $0x20] sm:$0xff]  ;;  %v693_v16 = vld [vmem:[%s927_s1 + $0x18] sm:$0xff]  ;;  %v692_v20 = vld [vmem:[%s927_s1 + $0x10] sm:$0xff] }
   0x6   :  { %415 = vmatpush.bf16.msra.mxu0 %v696_v2  ;;  %v702_v13 = vld [vmem:[%s927_s1 + $0x60] sm:$0xff]  ;;  %v701_v17 = vld [vmem:[%s927_s1 + $0x58] sm:$0xff]  ;;  %v700_v21 = vld [vmem:[%s927_s1 + $0x50] sm:$0xff] }
   0x7   :  { %428 = vmatpush.bf16.msra.mxu1 %v704_v3  ;;  %v710_v14 = vld [vmem:[%s927_s1 + $0xa0] sm:$0xff]  ;;  %v709_v18 = vld [vmem:[%s927_s1 + $0x98] sm:$0xff]  ;;  %v708_v22 = vld [vmem:[%s927_s1 + $0x90] sm:$0xff] }
   0x8   :  { %441 = vmatpush.bf16.msra.mxu2 %v712_v6  ;;  %v718_v15 = vld [vmem:[%s927_s1 + $0xe0] sm:$0xff]  ;;  %v717_v19 = vld [vmem:[%s927_s1 + $0xd8] sm:$0xff]  ;;  %v716_v23 = vld [vmem:[%s927_s1 + $0xd0] sm:$0xff] }
   0x9   :  { %454 = vmatpush.bf16.msra.mxu3 %v720_v7  ;;  %v691_v24 = vld [vmem:[%s927_s1 + $0x8] sm:$0xff]  ;;  %v690_v28 = vld [vmem:[%s927_s1] sm:$0xff]  ;;  %v729_v32 = vld [vmem:[%s927_s1 + $0x138] sm:$0xff] }
   0xa   :  { %416 = vmatpush.bf16.msra.mxu0 %v695_v8  ;;  %v699_v25 = vld [vmem:[%s927_s1 + $0x48] sm:$0xff]  ;;  %v698_v29 = vld [vmem:[%s927_s1 + $0x40] sm:$0xff]  ;;  %v737_v33 = vld [vmem:[%s927_s1 + $0x178] sm:$0xff] }
   0xb   :  { %429 = vmatpush.bf16.msra.mxu1 %v703_v9  ;;  %v707_v26 = vld [vmem:[%s927_s1 + $0x88] sm:$0xff]  ;;  %v14_v30 = vld [vmem:[%s929_s0] sm:$0xff]  ;;  %v16_v38 = vld [vmem:[%s929_s0 + $0x10] sm:$0xff] }
   0xc   :  { %442 = vmatpush.bf16.msra.mxu2 %v711_v10  ;;  %v715_v27 = vld [vmem:[%s927_s1 + $0xc8] sm:$0xff]  ;;  %v706_v34 = vld [vmem:[%s927_s1 + $0x80] sm:$0xff]  ;;  %v20_v36 = vpack.c.bf16 %v14_v30, %v14_v30  ;;  %v17_v39 = vld [vmem:[%s929_s0 + $0x18] sm:$0xff]  ;;  %v22_v42 = vpack.c.bf16 %v16_v38, %v16_v38 }
   0xd   :  { %455 = vmatpush.bf16.msra.mxu3 %v719_v11  ;;  %v15_v31 = vld [vmem:[%s929_s0 + $0x8] sm:$0xff]  ;;  %v714_v35 = vld [vmem:[%s927_s1 + $0xc0] sm:$0xff]  ;;  %v728_v40 = vld [vmem:[%s927_s1 + $0x130] sm:$0xff]  ;;  %v23_v43 = vpack.c.bf16 %v17_v39, %v17_v39 }
   0xe   :  { %417 = vmatpush.bf16.msra.mxu0 %v694_v12  ;;  %v21_v37 = vpack.c.bf16 %v15_v31, %v15_v31  ;;  %v736_v41 = vld [vmem:[%s927_s1 + $0x170] sm:$0xff]  ;;  %v727_v44 = vld [vmem:[%s927_s1 + $0x128] sm:$0xff]  ;;  %v726_v46 = vld [vmem:[%s927_s1 + $0x120] sm:$0xff] }
   0xf   :  { %430 = vmatpush.bf16.msra.mxu1 %v702_v13  ;;  %v735_v45 = vld [vmem:[%s927_s1 + $0x168] sm:$0xff]  ;;  %v734_v47 = vld [vmem:[%s927_s1 + $0x160] sm:$0xff]  ;;  %v725_v48 = vld [vmem:[%s927_s1 + $0x118] sm:$0xff] }
  0x10   :  { %443 = vmatpush.bf16.msra.mxu2 %v710_v14  ;;  %v733_v49 = vld [vmem:[%s927_s1 + $0x158] sm:$0xff]  ;;  %v724_v50 = vld [vmem:[%s927_s1 + $0x110] sm:$0xff]  ;;  %v723_v52 = vld [vmem:[%s927_s1 + $0x108] sm:$0xff] }
  0x11   :  { %456 = vmatpush.bf16.msra.mxu3 %v718_v15  ;;  %v732_v51 = vld [vmem:[%s927_s1 + $0x150] sm:$0xff]  ;;  %v731_v53 = vld [vmem:[%s927_s1 + $0x148] sm:$0xff]  ;;  %v722_v54 = vld [vmem:[%s927_s1 + $0x100] sm:$0xff] }
  0x12   :  { %418 = vmatpush.bf16.msra.mxu0 %v693_v16  ;;  %v730_v55 = vld [vmem:[%s927_s1 + $0x140] sm:$0xff]  ;;  %v19_v57 = vld [vmem:[%s929_s0 + $0x28] sm:$0xff] }
  0x13   :  { %431 = vmatpush.bf16.msra.mxu1 %v701_v17  ;;  %v18_v56 = vld [vmem:[%s929_s0 + $0x20] sm:$0xff]  ;;  %v25_v59 = vpack.c.bf16 %v19_v57, %v19_v57 }
  0x14   :  { %444 = vmatpush.bf16.msra.mxu2 %v709_v18  ;;  %v24_v58 = vpack.c.bf16 %v18_v56, %v18_v56  ;;  %v738_v2 = vld [vmem:[%s928_s2] ss:$0 sm:$0xff] }
  0x15   :  { %457 = vmatpush.bf16.msra.mxu3 %v717_v19 }
  0x16   :  { %419 = vmatpush.bf16.msra.mxu0 %v692_v20 }
  0x17   :  { %432 = vmatpush.bf16.msra.mxu1 %v700_v21 }
  0x18   :  { %445 = vmatpush.bf16.msra.mxu2 %v708_v22 }
  0x19   :  { %458 = vmatpush.bf16.msra.mxu3 %v716_v23 }
  0x1a   :  { %420 = vmatpush.bf16.msra.mxu0 %v691_v24 }
  0x1b   :  { %433 = vmatpush.bf16.msra.mxu1 %v699_v25 }
  0x1c   :  { %446 = vmatpush.bf16.msra.mxu2 %v707_v26 }
  0x1d   :  { %459 = vmatpush.bf16.msra.mxu3 %v715_v27 }
  0x1e   :  { %421 = vmatpush.bf16.msra.mxu0 %v690_v28 }
  0x1f   :  { %434 = vmatpush.bf16.msra.mxu1 %v698_v29 }
  0x20   :  { %447 = vmatpush.bf16.msra.mxu2 %v706_v34 }
  0x21   :  { %460 = vmatpush.bf16.msra.mxu3 %v714_v35  ;;  %422 = vmatmul.bf16.vlgmr.msra.gmra.mxu0 %v20_v36 }
  0x22   :  { %466 = vmatpush.bf16.msrb.mxu0 %v729_v32  ;;  %435 = vmatmul.bf16.vlgmr.msra.gmra.mxu1 %v21_v37 }
  0x23   :  { %479 = vmatpush.bf16.msrb.mxu1 %v737_v33  ;;  %448 = vmatmul.bf16.vlgmr.msra.gmra.mxu2 %v22_v42 }
  0x24   :  { %461 = vmatmul.bf16.vlgmr.msra.gmra.mxu3 %v23_v43 }
  0x26   :  { %467 = vmatpush.bf16.msrb.mxu0 %v728_v40 }
  0x27   :  { %480 = vmatpush.bf16.msrb.mxu1 %v736_v41 }
  0x2a   :  { %468 = vmatpush.bf16.msrb.mxu0 %v727_v44 }
  0x2b   :  { %481 = vmatpush.bf16.msrb.mxu1 %v735_v45 }
  0x2e   :  { %469 = vmatpush.bf16.msrb.mxu0 %v726_v46 }
  0x2f   :  { %482 = vmatpush.bf16.msrb.mxu1 %v734_v47 }
  0x32   :  { %470 = vmatpush.bf16.msrb.mxu0 %v725_v48 }
  0x33   :  { %483 = vmatpush.bf16.msrb.mxu1 %v733_v49 }
  0x36   :  { %471 = vmatpush.bf16.msrb.mxu0 %v724_v50 }
  0x37   :  { %484 = vmatpush.bf16.msrb.mxu1 %v732_v51 }
  0x3a   :  { %472 = vmatpush.bf16.msrb.mxu0 %v723_v52 }
  0x3b   :  { %485 = vmatpush.bf16.msrb.mxu1 %v731_v53 }
  0x3e   :  { %473 = vmatpush.bf16.msrb.mxu0 %v722_v54 }
  0x3f   :  { %486 = vmatpush.bf16.msrb.mxu1 %v730_v55 }
  0x41   :  { %474 = vmatmul.bf16.vlgmr.msrb.gmra.mxu0 %v24_v58 }
  0x42   :  { %487 = vmatmul.bf16.vlgmr.msrb.gmra.mxu1 %v25_v59 }
  0x9e   :  { %v423_v60 = vpop.f32.mrf.mxu0 }
  0x9f   :  { %v436_v61 = vpop.f32.mrf.mxu1  ;;  %v424_v3 = vadd.f32 %v738_v2, %v423_v60 }
  0xa1   :  { %v437_v6 = vadd.f32 %v436_v61, %v424_v3 }
  0xa6   :  { %v425_v62 = vpop.f32.mrf.mxu0  ;;  %v449_v0 = vpop.f32.mrf.mxu2 }
  0xa7   :  { %v438_v63 = vpop.f32.mrf.mxu1  ;;  %v462_v1 = vpop.f32.mrf.mxu3  ;;  %v450_v7 = vadd.f32 %v449_v0, %v437_v6 }
  0xa9   :  { %v463_v8 = vadd.f32 %v462_v1, %v450_v7 }
  0xae   :  { %v451_v4 = vpop.f32.mrf.mxu2 }
  0xaf   :  { %v464_v5 = vpop.f32.mrf.mxu3 }
  0xbe   :  { %v475_v9 = vpop.f32.mrf.mxu0 }
  0xbf   :  { %v488_v10 = vpop.f32.mrf.mxu1  ;;  %v476_v11 = vadd.f32 %v475_v9, %v463_v8 }
  0xc1   :  { %v489_v12 = vadd.f32 %v488_v10, %v476_v11 }
  0xc3   :  { %493 = vst.msk [vmem:[%s930_s3] sm:$0xff] %vm492_vm0, %v489_v12 }
  0xc6   :  { %v477_v13 = vpop.f32.mrf.mxu0 }
  0xc7   :  { %v490_v14 = vpop.f32.mrf.mxu1 }

// kernel: multimodal_forward.9
= control target key start
LH: loop header
LB: loop body
LE: loop exit
PB: predicated region body
PF: predicated region fallthrough
CT: control target
= control target key end

     0   :  { %v472_v11 = vmov 128.0   ;;  %s721_s0 = inlined_call_operand.vmem [shape: f32[32,128], index: 0, kind: input, shape index: {}]   ;;  %s722_s1 = inlined_call_operand.vmem [shape: f32[1,128], index: 1, kind: input, shape index: {}]   ;;  %s723_s2 = inlined_call_operand.vmem [shape: bf16[128,384], index: 2, kind: input, shape index: {}]   ;;  %s724_s3 = inlined_call_operand.vmem [shape: f32[32,384], index: 3, kind: output, shape index: {}]  }
   0x1   :  { %v496_v0 = vld [vmem:[%s721_s0 + $0x10] sm:$0xff]  ;;  %v501_v1 = vld [vmem:[%s721_s0] sm:$0xff]  ;;  %v510_v4 = vld [vmem:[%s721_s0 + $0x18] sm:$0xff]  ;;  %462 = vrcp.f32 %v472_v11 }
   0x2   :  { %v20_v2 = vmul.f32 %v496_v0, %v496_v0  ;;  %v18_v3 = vmul.f32 %v501_v1, %v501_v1  ;;  %v515_v5 = vld [vmem:[%s721_s0 + $0x8] sm:$0xff]  ;;  %v21_v6 = vmul.f32 %v510_v4, %v510_v4  ;;  %v450_v9 = vld [vmem:[%s723_s2 + $0xb0] sm:$0xf0]  ;;  %v420_v13 = vld [vmem:[%s723_s2 + $0xb4] sm:$0xf0] }
   0x3   :  { %v19_v7 = vmul.f32 %v515_v5, %v515_v5  ;;  %v418_v8 = vld [vmem:[%s723_s2 + $0xa8] sm:$0xf]  ;;  %v449_v10 = vld [vmem:[%s723_s2 + $0xac] sm:$0xf]  ;;  %v426_v14 = vld [vmem:[%s723_s2 + $0xb0] sm:$0xf] }
   0x4   :  { %26 = vadd.xlane.f32.xlu1 %v20_v2  ;;  %22 = vadd.xlane.f32.xlu0 %v18_v3  ;;  %v419_v12 = vor.u32 %v450_v9, %v418_v8  ;;  %v451_v15 = vld [vmem:[%s723_s2 + $0xb8] sm:$0xf0]  ;;  %v423_v16 = vor.u32 %v449_v10, %v420_v13  ;;  %v406_v18 = vld [vmem:[%s723_s2 + $0x90] sm:$0xf]  ;;  %v446_v20 = vld [vmem:[%s723_s2 + $0x94] sm:$0xf] }
   0x5   :  { %v427_v17 = vor.u32 %v451_v15, %v426_v14  ;;  %v447_v19 = vld [vmem:[%s723_s2 + $0x98] sm:$0xf0]  ;;  %v408_v22 = vld [vmem:[%s723_s2 + $0x9c] sm:$0xf0]  ;;  %v414_v23 = vld [vmem:[%s723_s2 + $0x98] sm:$0xf] }
   0x6   :  { %259 = vmatpush.bf16.msra.mxu0 %v419_v12  ;;  %452 = vmatpush.bf16.msra.mxu3 %v419_v12  ;;  %v407_v21 = vor.u32 %v447_v19, %v406_v18  ;;  %v448_v24 = vld [vmem:[%s723_s2 + $0xa0] sm:$0xf0]  ;;  %v411_v25 = vor.u32 %v446_v20, %v408_v22  ;;  %v394_v28 = vld [vmem:[%s723_s2 + $0x78] sm:$0xf]  ;;  %v443_v30 = vld [vmem:[%s723_s2 + $0x7c] sm:$0xf] }
   0x7   :  { %278 = vmatpush.bf16.msra.mxu1 %v423_v16  ;;  %297 = vmatpush.bf16.msra.mxu2 %v427_v17  ;;  %v415_v26 = vor.u32 %v448_v24, %v414_v23  ;;  %v557_v27 = vpop.eup %462  ;;  %v444_v29 = vld [vmem:[%s723_s2 + $0x80] sm:$0xf0]  ;;  %v396_v32 = vld [vmem:[%s723_s2 + $0x84] sm:$0xf0]  ;;  %v402_v33 = vld [vmem:[%s723_s2 + $0x80] sm:$0xf] }
   0x8   :  { %v395_v31 = vor.u32 %v444_v29, %v394_v28  ;;  %v445_v34 = vld [vmem:[%s723_s2 + $0x88] sm:$0xf0]  ;;  %v31_v35 = vmul.f32 128.0, %v557_v27  ;;  %v399_v36 = vor.u32 %v443_v30, %v396_v32  ;;  %v382_v38 = vld [vmem:[%s723_s2 + $0x60] sm:$0xf]  ;;  %vm35_vm0 = vweird.f32 %v557_v27 }
   0x9   :  { %v403_v37 = vor.u32 %v445_v34, %v402_v33  ;;  %v441_v39 = vld [vmem:[%s723_s2 + $0x68] sm:$0xf0]  ;;  %v440_v40 = vld [vmem:[%s723_s2 + $0x64] sm:$0xf]  ;;  %v384_v42 = vld [vmem:[%s723_s2 + $0x6c] sm:$0xf0] }
   0xa   :  { %260 = vmatpush.bf16.msra.mxu0 %v407_v21  ;;  %453 = vmatpush.bf16.msra.mxu3 %v407_v21  ;;  %v383_v41 = vor.u32 %v441_v39, %v382_v38  ;;  %v390_v43 = vld [vmem:[%s723_s2 + $0x68] sm:$0xf]  ;;  %v442_v44 = vld [vmem:[%s723_s2 + $0x70] sm:$0xf0]  ;;  %v32_v45 = vsub.f32 1.0, %v31_v35  ;;  %v387_v46 = vor.u32 %v440_v40, %v384_v42 }
   0xb   :  { %279 = vmatpush.bf16.msra.mxu1 %v411_v25  ;;  %298 = vmatpush.bf16.msra.mxu2 %v415_v26  ;;  %v391_v47 = vor.u32 %v442_v44, %v390_v43  ;;  %v370_v48 = vld [vmem:[%s723_s2 + $0x48] sm:$0xf]  ;;  %v438_v49 = vld [vmem:[%s723_s2 + $0x50] sm:$0xf0]  ;;  %v437_v50 = vld [vmem:[%s723_s2 + $0x4c] sm:$0xf] }
   0xc   :  { %28 = vadd.xlane.f32.xlu1 %v21_v6  ;;  %24 = vadd.xlane.f32.xlu0 %v19_v7  ;;  %v371_v51 = vor.u32 %v438_v49, %v370_v48  ;;  %v372_v52 = vld [vmem:[%s723_s2 + $0x54] sm:$0xf0]  ;;  %v378_v53 = vld [vmem:[%s723_s2 + $0x50] sm:$0xf]  ;;  %v439_v54 = vld [vmem:[%s723_s2 + $0x58] sm:$0xf0]  ;;  %v33_v55 = vmul.f32 %v557_v27, %v32_v45 }
   0xd   :  { %v375_v56 = vor.u32 %v437_v50, %v372_v52  ;;  %v379_v57 = vor.u32 %v439_v54, %v378_v53  ;;  %v358_v58 = vld [vmem:[%s723_s2 + $0x30] sm:$0xf]  ;;  %v435_v59 = vld [vmem:[%s723_s2 + $0x38] sm:$0xf0]  ;;  %v434_v60 = vld [vmem:[%s723_s2 + $0x34] sm:$0xf] }
   0xe   :  { %261 = vmatpush.bf16.msra.mxu0 %v395_v31  ;;  %454 = vmatpush.bf16.msra.mxu3 %v395_v31  ;;  %v359_v61 = vor.u32 %v435_v59, %v358_v58  ;;  %v360_v62 = vld [vmem:[%s723_s2 + $0x3c] sm:$0xf0]  ;;  %v366_v63 = vld [vmem:[%s723_s2 + $0x38] sm:$0xf]  ;;  %v436_v2 = vld [vmem:[%s723_s2 + $0x40] sm:$0xf0]  ;;  %v34_v3 = vadd.f32 %v557_v27, %v33_v55 }
   0xf   :  { %280 = vmatpush.bf16.msra.mxu1 %v399_v36  ;;  %299 = vmatpush.bf16.msra.mxu2 %v403_v37  ;;  %v363_v6 = vor.u32 %v434_v60, %v360_v62  ;;  %v367_v7 = vor.u32 %v436_v2, %v366_v63  ;;  %v346_v8 = vld [vmem:[%s723_s2 + $0x18] sm:$0xf]  ;;  %v432_v9 = vld [vmem:[%s723_s2 + $0x20] sm:$0xf0]  ;;  %v431_v10 = vld [vmem:[%s723_s2 + $0x1c] sm:$0xf] }
  0x10   :  { %v347_v11 = vor.u32 %v432_v9, %v346_v8  ;;  %v348_v12 = vld [vmem:[%s723_s2 + $0x24] sm:$0xf0]  ;;  %v354_v13 = vld [vmem:[%s723_s2 + $0x20] sm:$0xf]  ;;  %v433_v14 = vld [vmem:[%s723_s2 + $0x28] sm:$0xf0]  ;;  %v36_v15 = vsel %vm35_vm0, %v557_v27, %v34_v3 }
  0x11   :  { %v351_v16 = vor.u32 %v431_v10, %v348_v12  ;;  %v355_v17 = vor.u32 %v433_v14, %v354_v13  ;;  %v334_v18 = vld [vmem:[%s723_s2] sm:$0xf]  ;;  %v429_v19 = vld [vmem:[%s723_s2 + $0x8] sm:$0xf0]  ;;  %v428_v20 = vld [vmem:[%s723_s2 + $0x4] sm:$0xf] }
  0x12   :  { %262 = vmatpush.bf16.msra.mxu0 %v383_v41  ;;  %455 = vmatpush.bf16.msra.mxu3 %v383_v41  ;;  %v335_v23 = vor.u32 %v429_v19, %v334_v18  ;;  %v336_v24 = vld [vmem:[%s723_s2 + $0xc] sm:$0xf0]  ;;  %v342_v25 = vld [vmem:[%s723_s2 + $0x8] sm:$0xf]  ;;  %v430_v26 = vld [vmem:[%s723_s2 + $0x10] sm:$0xf0] }
  0x13   :  { %281 = vmatpush.bf16.msra.mxu1 %v387_v46  ;;  %300 = vmatpush.bf16.msra.mxu2 %v391_v47  ;;  %v339_v29 = vor.u32 %v428_v20, %v336_v24  ;;  %v343_v30 = vor.u32 %v430_v26, %v342_v25 }
  0x16   :  { %263 = vmatpush.bf16.msra.mxu0 %v371_v51  ;;  %456 = vmatpush.bf16.msra.mxu3 %v371_v51 }
  0x17   :  { %282 = vmatpush.bf16.msra.mxu1 %v375_v56  ;;  %301 = vmatpush.bf16.msra.mxu2 %v379_v57 }
  0x1a   :  { %264 = vmatpush.bf16.msra.mxu0 %v359_v61  ;;  %457 = vmatpush.bf16.msra.mxu3 %v359_v61 }
  0x1b   :  { %283 = vmatpush.bf16.msra.mxu1 %v363_v6  ;;  %302 = vmatpush.bf16.msra.mxu2 %v367_v7  ;;  %v461_v6 = vld [vmem:[%s722_s1] ss:$0 sm:$0xff] }
  0x1e   :  { %265 = vmatpush.bf16.msra.mxu0 %v347_v11  ;;  %458 = vmatpush.bf16.msra.mxu3 %v347_v11 }
  0x1f   :  { %284 = vmatpush.bf16.msra.mxu1 %v351_v16  ;;  %303 = vmatpush.bf16.msra.mxu2 %v355_v17 }
  0x22   :  { %266 = vmatpush.bf16.msra.mxu0 %v335_v23  ;;  %459 = vmatpush.bf16.msra.mxu3 %v335_v23 }
  0x23   :  { %285 = vmatpush.bf16.msra.mxu1 %v339_v29  ;;  %304 = vmatpush.bf16.msra.mxu2 %v343_v30 }
  0x77   :  { %v27_v21 = vpop.xlane.xlu1 %26  ;;  %v23_v22 = vpop.xlane.xlu0 %22 }
  0x78   :  { %v39_v27 = vmul.f32 %v36_v15, %v27_v21  ;;  %v37_v28 = vmul.f32 %v36_v15, %v23_v22 }
  0x7a   :  { %v43_v31 = vadd.f32 1e-06, %v39_v27  ;;  %v41_v32 = vadd.f32 1e-06, %v37_v28 }
  0x7c   :  { %464 = vrsqrt.f32 %v43_v31  ;;  %vm71_vm1 = vweird.f32 %v43_v31  ;;  %vm51_vm7 = vweird.f32 %v41_v32 }
  0x7d   :  { %466 = vrsqrt.f32 %v41_v32 }
  0x7f   :  { %v29_v33 = vpop.xlane.xlu1 %28  ;;  %v25_v34 = vpop.xlane.xlu0 %24 }
  0x80   :  { %v40_v35 = vmul.f32 %v36_v15, %v29_v33  ;;  %v38_v36 = vmul.f32 %v36_v15, %v25_v34 }
  0x82   :  { %v465_v37 = vpop.eup %464  ;;  %v44_v38 = vadd.f32 1e-06, %v40_v35  ;;  %v42_v39 = vadd.f32 1e-06, %v38_v36 }
  0x83   :  { %v467_v40 = vpop.eup %466  ;;  %v66_v41 = vmul.f32 %v465_v37, %v43_v31  ;;  %vm72_vm2 = vweird.f32 %v465_v37 }
  0x84   :  { %v46_v42 = vmul.f32 %v467_v40, %v41_v32  ;;  %468 = vrsqrt.f32 %v44_v38  ;;  %vm672_vm3 = vmor %vm71_vm1, %vm72_vm2  ;;  %vm52_vm4 = vweird.f32 %v467_v40  ;;  %vm81_vm5 = vweird.f32 %v44_v38 }
  0x85   :  { %v67_v43 = vmul.f32 %v465_v37, %v66_v41  ;;  %470 = vrsqrt.f32 %v42_v39  ;;  %vm53_vm8 = vmor %vm51_vm7, %vm52_vm4  ;;  %vm61_vm11 = vweird.f32 %v42_v39 }
  0x86   :  { %v47_v44 = vmul.f32 %v467_v40, %v46_v42 }
  0x87   :  { %v68_v45 = vmul.f32 0.5, %v67_v43 }
  0x88   :  { %v48_v46 = vmul.f32 0.5, %v47_v44 }
  0x89   :  { %v69_v47 = vsub.f32 1.5, %v68_v45 }
  0x8a   :  { %v469_v48 = vpop.eup %468  ;;  %v49_v49 = vsub.f32 1.5, %v48_v46 }
  0x8b   :  { %v471_v50 = vpop.eup %470  ;;  %v76_v51 = vmul.f32 %v469_v48, %v44_v38  ;;  %v70_v53 = vmul.f32 %v465_v37, %v69_v47  ;;  %vm82_vm6 = vweird.f32 %v469_v48 }
  0x8c   :  { %v56_v52 = vmul.f32 %v471_v50, %v42_v39  ;;  %v50_v56 = vmul.f32 %v467_v40, %v49_v49  ;;  %vm83_vm9 = vmor %vm81_vm5, %vm82_vm6  ;;  %vm62_vm10 = vweird.f32 %v471_v50 }
  0x8d   :  { %v77_v54 = vmul.f32 %v469_v48, %v76_v51  ;;  %v74_v60 = vsel %vm672_vm3, %v465_v37, %v70_v53  ;;  %vm63_vm12 = vmor %vm61_vm11, %vm62_vm10 }
  0x8e   :  { %v57_v57 = vmul.f32 %v471_v50, %v56_v52  ;;  %v54_v62 = vsel %vm53_vm8, %v467_v40, %v50_v56  ;;  %v87_v7 = vmul.f32 %v74_v60, %v496_v0 }
  0x8f   :  { %v78_v58 = vmul.f32 0.5, %v77_v54  ;;  %v85_v9 = vmul.f32 %v54_v62, %v501_v1 }
  0x90   :  { %v58_v59 = vmul.f32 0.5, %v57_v57  ;;  %v95_v13 = vmul.f32 %v461_v6, %v87_v7 }
  0x91   :  { %v79_v61 = vsub.f32 1.5, %v78_v58  ;;  %v93_v15 = vmul.f32 %v461_v6, %v85_v9 }
  0x92   :  { %v59_v63 = vsub.f32 1.5, %v58_v59 }
  0x93   :  { %v80_v2 = vmul.f32 %v469_v48, %v79_v61 }
  0x94   :  { %v60_v3 = vmul.f32 %v471_v50, %v59_v63 }
  0x95   :  { %v84_v8 = vsel %vm83_vm9, %v469_v48, %v80_v2 }
  0x96   :  { %v64_v10 = vsel %vm63_vm12, %v471_v50, %v60_v3  ;;  %v88_v11 = vmul.f32 %v84_v8, %v510_v4 }
  0x97   :  { %v86_v12 = vmul.f32 %v64_v10, %v515_v5 }
  0x98   :  { %v96_v14 = vmul.f32 %v461_v6, %v88_v11 }
  0x99   :  { %v94_v16 = vmul.f32 %v461_v6, %v86_v12 }
  0x9a   :  { %v98_v17 = vpack.c.bf16 %v96_v14, %v95_v13 }
  0x9b   :  { %v97_v18 = vpack.c.bf16 %v94_v16, %v93_v15 }
  0x9c   :  { %272 = vmatmul.bf16.vlgmr.msra.gmra.mxu3 %v98_v17 }
  0x9d   :  { %267 = vmatmul.bf16.vlgmr.msra.gmra.mxu0 %v97_v18  ;;  %286 = vmatmul.bf16.vlgmr.msra.gmra.mxu1 %v97_v18 }
  0x9e   :  { %305 = vmatmul.bf16.vlgmr.msra.gmra.mxu2 %v97_v18 }
  0xad   :  { %291 = vmatmul.bf16.gmra.mxu1 %v98_v17 }
  0xae   :  { %310 = vmatmul.bf16.gmra.mxu2 %v98_v17 }
 0x11a   :  { %v268_v0 = vpop.f32.mrf.mxu0  ;;  %v287_v19 = vpop.f32.mrf.mxu1 }
 0x11b   :  { %316 = vst [vmem:[%s724_s3] sm:$0xff] %v268_v0 }
 0x11c   :  { %317 = vst [vmem:[%s724_s3 + $0x8] sm:$0xff] %v287_v19 }
 0x11f   :  { %v273_v1 = vpop.f32.mrf.mxu3 }
 0x120   :  { %322 = vst [vmem:[%s724_s3 + $0x30] sm:$0xff] %v273_v1 }
 0x121   :  { %v306_v4 = vpop.f32.mrf.mxu2 }
 0x122   :  { %318 = vst [vmem:[%s724_s3 + $0x10] sm:$0xff] %v306_v4  ;;  %v270_v5 = vpop.f32.mrf.mxu0  ;;  %v289_v20 = vpop.f32.mrf.mxu1 }
 0x123   :  { %319 = vst [vmem:[%s724_s3 + $0x18] sm:$0xff] %v270_v5 }
 0x124   :  { %320 = vst [vmem:[%s724_s3 + $0x20] sm:$0xff] %v289_v20 }
 0x127   :  { %v275_v21 = vpop.f32.mrf.mxu3 }
 0x128   :  { %325 = vst [vmem:[%s724_s3 + $0x48] sm:$0xff] %v275_v21 }
 0x129   :  { %v308_v22 = vpop.f32.mrf.mxu2 }
 0x12a   :  { %321 = vst [vmem:[%s724_s3 + $0x28] sm:$0xff] %v308_v22  ;;  %v292_v23 = vpop.f32.mrf.mxu1 }
 0x12b   :  { %323 = vst [vmem:[%s724_s3 + $0x38] sm:$0xff] %v292_v23 }
 0x131   :  { %v311_v24 = vpop.f32.mrf.mxu2 }
 0x132   :  { %324 = vst [vmem:[%s724_s3 + $0x40] sm:$0xff] %v311_v24  ;;  %v294_v25 = vpop.f32.mrf.mxu1 }
 0x133   :  { %326 = vst [vmem:[%s724_s3 + $0x50] sm:$0xff] %v294_v25 }
 0x139   :  { %v313_v26 = vpop.f32.mrf.mxu2 }
 0x13a   :  { %327 = vst [vmem:[%s724_s3 + $0x58] sm:$0xff] %v313_v26 }

// kernel: multimodal_forward.11
= control target key start
LH: loop header
LB: loop body
LE: loop exit
PB: predicated region body
PF: predicated region fallthrough
CT: control target
= control target key end

     0   :  { %s247_s1 = inlined_call_operand.vmem [shape: bf16[128,128], index: 1, kind: input, shape index: {}]   ;;  %s248_s0 = inlined_call_operand.vmem [shape: f32[32,128], index: 0, kind: input, shape index: {}]   ;;  %s249_s2 = inlined_call_operand.vmem [shape: f32[32,128], index: 2, kind: input, shape index: {}]   ;;  %s250_s3 = inlined_call_operand.vmem [shape: f32[32,128], index: 3, kind: output, shape index: {}]  }
   0x1   :  { %v158_v0 = vld [vmem:[%s247_s1 + $0x38] sm:$0xff]  ;;  %v157_v1 = vld [vmem:[%s247_s1 + $0x30] sm:$0xff]  ;;  %v156_v2 = vld [vmem:[%s247_s1 + $0x28] sm:$0xff] }
   0x2   :  { %88 = vmatpush.bf16.msra.mxu0 %v158_v0  ;;  %159 = vmatpush.bf16.msra.mxu1 %v158_v0  ;;  %v155_v3 = vld [vmem:[%s247_s1 + $0x20] sm:$0xff]  ;;  %v154_v4 = vld [vmem:[%s247_s1 + $0x18] sm:$0xff]  ;;  %v153_v5 = vld [vmem:[%s247_s1 + $0x10] sm:$0xff] }
   0x3   :  { %v152_v6 = vld [vmem:[%s247_s1 + $0x8] sm:$0xff]  ;;  %v151_v7 = vld [vmem:[%s247_s1] sm:$0xff]  ;;  %v16_v10 = vld [vmem:[%s248_s0 + $0x10] sm:$0xff] }
   0x4   :  { %v14_v8 = vld [vmem:[%s248_s0] sm:$0xff]  ;;  %v15_v9 = vld [vmem:[%s248_s0 + $0x8] sm:$0xff]  ;;  %v17_v11 = vld [vmem:[%s248_s0 + $0x18] sm:$0xff] }
   0x5   :  { %v18_v12 = vpack.c.bf16 %v15_v9, %v14_v8  ;;  %v19_v13 = vpack.c.bf16 %v17_v11, %v16_v10  ;;  %v20_v14 = vld [vmem:[%s249_s2] sm:$0xff]  ;;  %v22_v15 = vld [vmem:[%s249_s2 + $0x10] sm:$0xff]  ;;  %v21_v20 = vld [vmem:[%s249_s2 + $0x8] sm:$0xff] }
   0x6   :  { %89 = vmatpush.bf16.msra.mxu0 %v157_v1  ;;  %160 = vmatpush.bf16.msra.mxu1 %v157_v1  ;;  %v23_v21 = vld [vmem:[%s249_s2 + $0x18] sm:$0xff] }
   0xa   :  { %90 = vmatpush.bf16.msra.mxu0 %v156_v2  ;;  %161 = vmatpush.bf16.msra.mxu1 %v156_v2 }
   0xe   :  { %91 = vmatpush.bf16.msra.mxu0 %v155_v3  ;;  %162 = vmatpush.bf16.msra.mxu1 %v155_v3 }
  0x12   :  { %92 = vmatpush.bf16.msra.mxu0 %v154_v4  ;;  %163 = vmatpush.bf16.msra.mxu1 %v154_v4 }
  0x16   :  { %93 = vmatpush.bf16.msra.mxu0 %v153_v5  ;;  %164 = vmatpush.bf16.msra.mxu1 %v153_v5 }
  0x1a   :  { %94 = vmatpush.bf16.msra.mxu0 %v152_v6  ;;  %165 = vmatpush.bf16.msra.mxu1 %v152_v6 }
  0x1e   :  { %95 = vmatpush.bf16.msra.mxu0 %v151_v7  ;;  %166 = vmatpush.bf16.msra.mxu1 %v151_v7 }
  0x21   :  { %96 = vmatmul.bf16.vlgmr.msra.gmra.mxu0 %v18_v12  ;;  %101 = vmatmul.bf16.vlgmr.msra.gmra.mxu1 %v19_v13 }
  0x9e   :  { %v97_v16 = vpop.f32.mrf.mxu0  ;;  %v102_v17 = vpop.f32.mrf.mxu1 }
  0x9f   :  { %v107_v18 = vadd.f32 %v97_v16, %v20_v14  ;;  %v109_v19 = vadd.f32 %v102_v17, %v22_v15 }
  0xa1   :  { %111 = vst [vmem:[%s250_s3] sm:$0xff] %v107_v18 }
  0xa2   :  { %113 = vst [vmem:[%s250_s3 + $0x10] sm:$0xff] %v109_v19 }
  0xa6   :  { %v99_v22 = vpop.f32.mrf.mxu0  ;;  %v104_v23 = vpop.f32.mrf.mxu1 }
  0xa7   :  { %v108_v24 = vadd.f32 %v99_v22, %v21_v20  ;;  %v110_v25 = vadd.f32 %v104_v23, %v23_v21 }
  0xa9   :  { %112 = vst [vmem:[%s250_s3 + $0x8] sm:$0xff] %v108_v24 }
  0xaa   :  { %114 = vst [vmem:[%s250_s3 + $0x18] sm:$0xff] %v110_v25 }

// kernel: multimodal_forward.10
= control target key start
LH: loop header
LB: loop body
LE: loop exit
PB: predicated region body
PF: predicated region fallthrough
CT: control target
= control target key end

     0   :  { %s789_s15 = smov 0   ;;  %s920_s0 = inlined_call_operand.vmem [shape: f32[2,16,128], index: 0, kind: input, shape index: {}]   ;;  %s921_s1 = inlined_call_operand.vmem [shape: f32[2,16,128], index: 1, kind: input, shape index: {}]   ;;  %s922_s2 = inlined_call_operand.vmem [shape: f32[2,16,128], index: 2, kind: input, shape index: {}]   ;;  %s923_s3 = inlined_call_operand.vmem [shape: f32[2,1,16], index: 3, kind: input, shape index: {}]   ;;  %s924_s4 = inlined_call_operand.vmem [shape: f32[2,16,128], index: 4, kind: output, shape index: {}]  }
   0x1 LB: > { %s681_s16 = sadd.s32 4294967295, %s758_s15   ;;  %p685_p0 = scmp.ge.s32.totalorder %s758_s15, 1  ;;  %s758_s15 = sphi %s789_s15, %s14_s15  }
   0x2   : > { %p190_p1 = scmp.lt.s32.totalorder %s758_s15, 3 }
   0x4   : > { %p191_p2 = pnand %p685_p0, %p190_p1 }
   0x5   : > { %p229_p3 = scmp.lt.s32.totalorder (!%p191_p2), %s681_s16, 1  ;;  %s760_s24 = smov (!%p191_p2), 96  }
   0x6   : > { %194 = sbr.rel (%p191_p2) target bundleno = 1092 (0x444), region = 36  ;;  %s761_s25 = smov (!%p191_p2), 32  }
   0x7   : > { %s763_s29 = smov (!%p191_p2), 64  }
   0xb   : > { %s930_s16 = smov (!%p229_p3, %s681_s16), 1  ;;  %vm276_vm0 = vcmask 261120   ;;  %v260_v11 = vlaneseq  ;;  %v762_v12 = vmov 0   ;;  %vm301_vm5 = vcmask 130048  }
   0xc   : > { %s797_s17 = sshll.u32 %s930_s16, 4  ;;  %s246_s28 = scalar_lea.vmem %s923_s3, %s930_s16  ;;  %vm426_vm8 = vcmask 523520   ;;  %vm508_vm9 = vcmask 785920   ;;  %vm590_vm10 = vcmask 1048320  }
   0xd   : > { %s238_s20 = scalar_lea.vmem %s921_s1, %s797_s17  ;;  %s233_s23 = scalar_lea.vmem %s920_s0, %s797_s17  ;;  %v259_v9 = vld [vmem:[%s246_s28] sm:$0x1]  ;;  %v261_v14 = vshrl.u32 %v260_v11, 7  ;;  %v264_v15 = vand.u32 127, %v260_v11 }
   0xe   : > { %v255_v0 = vld [vmem:[%s238_s20] sm:$0xff]  ;;  %v256_v1 = vld [vmem:[%s238_s20 + $0x8] sm:$0xff]  ;;  %vm267_vm1 = vcmp.gt.f32.partialorder %v259_v9, 0.5  ;;  %s243_s6 = scalar_lea.vmem %s922_s2, %s797_s17  ;;  %s873_s9 = scalar_lea.vmem %s924_s4, %s797_s17 }
   0xf   : > { %v253_v2 = vld [vmem:[%s233_s23] sm:$0xff]  ;;  %v274_v3 = vpack.c.bf16 %v256_v1, %v255_v0  ;;  %v254_v4 = vld [vmem:[%s233_s23 + $0x8] sm:$0xff]  ;;  %v268_v13 = vsel %vm267_vm1, 1, %v762_v12  ;;  %vm265_vm2 = vcmp.le.s32.totalorder %v264_v15, %v261_v14  ;;  %v262_v20 = vadd.s32 8, %v261_v14 }
  0x10   : > { %v807_v5 = vpack.c.bf16 %v254_v4, %v253_v2  ;;  %v269_v16 = vperm.slane %v268_v13, 0  ;;  %v257_v48 = vld [vmem:[%s243_s6] sm:$0xff]  ;;  %v258_v49 = vld [vmem:[%s243_s6 + $0x8] sm:$0xff] }
  0x11   : > { %v281_v6 = vsel %vm276_vm0, %v274_v3, 0  ;;  %348 = vrot.lane.b32.xlu1 %v274_v3, %s760_s24  ;;  %vm266_vm6 = vcmp.le.s32.totalorder %v264_v15, %v262_v20  ;;  %v856_v50 = vpack.c.bf16 %v258_v49, %v257_v48 }
  0x12   : > { %290 = vmatpush.bf16.xpose.msra.mxu0 %v281_v6  ;;  %345 = vrot.lane.b32.xlu2 %v807_v5, %s760_s24  ;;  %vm270_vm3 = vcmp.eq.s32.totalorder %v269_v16, 1 }
  0x13   : > { %vm821_vm4 = vmand %vm265_vm2, %vm270_vm3  ;;  %335 = vmatpush.bf16.msra.mxu1 %v856_v50 }
  0x14   : > { %vm828_vm7 = vmand %vm266_vm6, %vm270_vm3 }
  0x19   : > { %694 = vmatmul.msk.bf16.vlgmr.msra.gmra.mxu0 %vm276_vm0, %v807_v5 }
  0x1a   : > { %513 = vrot.lane.b32.xlu2 %v274_v3, %s761_s25 }
  0x6c   : > { %v346_v10 = vpop.permute.xlu2 %345 }
  0x74   : > { %v514_v36 = vpop.permute.xlu2 %513 }
  0x75   : > { %v519_v38 = vsel %vm276_vm0, %v514_v36, 0 }
  0x76   : > { %528 = vmatpush.bf16.xpose.msrb.mxu0 %v519_v38 }
  0x83   : > { %v349_v7 = vpop.permute.xlu1 %348 }
  0x84   : > { %v354_v8 = vsel %vm276_vm0, %v349_v7, 0 }
  0x85   : > { %363 = vmatpush.bf16.xpose.msra.mxu2 %v354_v8 }
  0x8c   : > { %696 = vmatmul.msk.bf16.vlgmr.msra.gmra.mxu2 %vm276_vm0, %v346_v10 }
  0x96   : > { %v292_v17 = vpop.f32.mrf.mxu0 }
  0x97   : > { %v297_v19 = vmul.f32 0.17677669, %v292_v17 }
  0x99   : > { %v299_v21 = vsel %vm821_vm4, %v297_v19, -1e+30 }
  0x9a   : > { %v302_v22 = vsel %vm301_vm5, %v299_v21, -inf }
  0x9b   : > { %303 = vmax.xlane.f32.xlu0 %v302_v22 }
  0x9e   : > { %v294_v23 = vpop.f32.mrf.mxu0 }
  0x9f   : > { %v298_v25 = vmul.f32 0.17677669, %v294_v23 }
  0xa1   : > { %v300_v26 = vsel %vm828_vm7, %v298_v25, -1e+30 }
  0xa2   : > { %v305_v27 = vsel %vm301_vm5, %v300_v26, -inf }
  0xa3   : > { %306 = vmax.xlane.f32.xlu0 %v305_v27 }
  0xb7   : > { %431 = vrot.lane.b32.xlu0 %v274_v3, %s763_s29 }
  0xbf   : > { %429 = vrot.lane.b32.xlu0 %v807_v5, %s763_s29 }
 0x10e   : > { %v304_v28 = vpop.xlane.xlu0 %303 }
 0x10f   : > { %v308_v29 = vsub.f32 %v299_v21, %v304_v28  ;;  %v365_v37 = vpop.f32.mrf.mxu2 }
 0x110   : > { %v370_v39 = vmul.f32 0.17677669, %v365_v37 }
 0x111   : > { %v310_v30 = vmul.f32 1.442695, %v308_v29 }
 0x112   : > { %v842_v40 = vsel %vm821_vm4, %v370_v39, -1e+30 }
 0x113   : > { %720 = vpow2.f32 %v310_v30  ;;  %v374_v41 = vsel %vm301_vm5, %v842_v40, -inf }
 0x114   : > { %375 = vmax.xlane.f32.xlu0 %v374_v41 }
 0x116   : > { %v307_v31 = vpop.xlane.xlu0 %306 }
 0x117   : > { %v309_v32 = vsub.f32 %v300_v26, %v307_v31  ;;  %v367_v44 = vpop.f32.mrf.mxu2 }
 0x118   : > { %v371_v45 = vmul.f32 0.17677669, %v367_v44 }
 0x119   : > { %v721_v33 = vpop.eup %720  ;;  %v312_v34 = vmul.f32 1.442695, %v309_v32 }
 0x11a   : > { %v314_v35 = vsel %vm301_vm5, %v721_v33, 0.0  ;;  %v373_v46 = vsel %vm828_vm7, %v371_v45, -1e+30 }
 0x11b   : > { %722 = vpow2.f32 %v312_v34  ;;  %315 = vadd.xlane.f32.xlu1 %v314_v35  ;;  %v377_v47 = vsel %vm301_vm5, %v373_v46, -inf }
 0x121   : > { %v723_v42 = vpop.eup %722 }
 0x122   : > { %v317_v43 = vsel %vm301_vm5, %v723_v42, 0.0 }
 0x123   : > { %318 = vadd.xlane.f32.xlu2 %v317_v43 }
 0x129   : > { %v432_v51 = vpop.permute.xlu0 %431 }
 0x12a   : > { %v437_v52 = vsel %vm276_vm0, %v432_v51, 0 }
 0x12b   : > { %446 = vmatpush.bf16.xpose.msrb.mxu1 %v437_v52 }
 0x131   : > { %v430_v61 = vpop.permute.xlu0 %429 }
 0x13b   : > { %511 = vrot.lane.b32.xlu2 %v807_v5, %s761_s25 }
 0x164   : > { %378 = vmax.xlane.f32.xlu2 %v377_v47 }
 0x17c   : > { %398 = vrot.lane.b32.xlu2 %v856_v50, %s760_s24 }
 0x187   : > { %v376_v13 = vpop.xlane.xlu0 %375 }
 0x188   : > { %v380_v16 = vsub.f32 %v842_v40, %v376_v13 }
 0x18a   : > { %v382_v20 = vmul.f32 1.442695, %v380_v16 }
 0x18e   : > { %v316_v53 = vpop.xlane.xlu1 %315 }
 0x18f   : > { %724 = vrcp.f32 %v316_v53 }
 0x195   : > { %v725_v55 = vpop.eup %724 }
 0x196   : > { %v319_v54 = vpop.xlane.xlu2 %318  ;;  %v322_v58 = vmul.f32 %v725_v55, %v721_v33 }
 0x197   : > { %726 = vrcp.f32 %v319_v54 }
 0x19d   : > { %v727_v56 = vpop.eup %726 }
 0x19e   : > { %v512_v57 = vpop.permute.xlu2 %511  ;;  %v323_v59 = vmul.f32 %v727_v56, %v723_v42 }
 0x19f   : > { %700 = vmatmul.msk.bf16.vlgmr.msrb.gmra.mxu0 %vm276_vm0, %v512_v57 }
 0x1a0   : > { %v324_v60 = vpack.c.bf16 %v323_v59, %v322_v58 }
 0x1a2   : > { %695 = vmatmul.msk.bf16.vlgmr.msra.gmra.mxu1 %vm301_vm5, %v324_v60 }
 0x1b2   : > { %698 = vmatmul.msk.bf16.vlgmr.msrb.gmra.mxu1 %vm276_vm0, %v430_v61 }
 0x1d7   : > { %v379_v62 = vpop.xlane.xlu2 %378 }
 0x1d8   : > { %v381_v63 = vsub.f32 %v373_v46, %v379_v62 }
 0x1da   : > { %v384_v0 = vmul.f32 1.442695, %v381_v63 }
 0x1dc   : > { %728 = vpow2.f32 %v384_v0 }
 0x1dd   : > { %730 = vpow2.f32 %v382_v20 }
 0x1df   : > { %v399_v31 = vpop.permute.xlu2 %398 }
 0x1e0   : > { %411 = vmatpush.bf16.msra.mxu3 %v399_v31 }
 0x1e2   : > { %v865_v1 = vpop.eup %728 }
 0x1e3   : > { %v389_v2 = vsel %vm301_vm5, %v865_v1, 0.0  ;;  %v731_v26 = vpop.eup %730 }
 0x1e4   : > { %390 = vadd.xlane.f32.xlu0 %v389_v2  ;;  %v386_v27 = vsel %vm301_vm5, %v731_v26, 0.0 }
 0x21c   : > { %v530_v3 = vpop.f32.mrf.mxu0 }
 0x21d   : > { %v535_v4 = vmul.f32 0.17677669, %v530_v3 }
 0x21f   : > { %v337_v5 = vpop.f32.mrf.mxu1  ;;  %v537_v6 = vsel %vm821_vm4, %v535_v4, -1e+30 }
 0x220   : > { %342 = vst.msk [vmem:[%s873_s9] sm:$0xff] %vm276_vm0, %v337_v5  ;;  %v539_v7 = vsel %vm301_vm5, %v537_v6, -inf }
 0x221   : > { %540 = vmax.xlane.f32.xlu1 %v539_v7 }
 0x224   : > { %v532_v8 = vpop.f32.mrf.mxu0 }
 0x225   : > { %v536_v9 = vmul.f32 0.17677669, %v532_v8 }
 0x227   : > { %v339_v10 = vpop.f32.mrf.mxu1  ;;  %v538_v11 = vsel %vm828_vm7, %v536_v9, -1e+30 }
 0x228   : > { %343 = vst.msk [vmem:[%s873_s9 + $0x8] sm:$0xff] %vm276_vm0, %v339_v10  ;;  %v542_v12 = vsel %vm301_vm5, %v538_v11, -inf }
 0x229   : > { %543 = vmax.xlane.f32.xlu1 %v542_v12 }
 0x22f   : > { %v448_v14 = vpop.f32.mrf.mxu1 }
 0x230   : > { %v453_v15 = vmul.f32 0.17677669, %v448_v14 }
 0x232   : > { %v455_v17 = vsel %vm821_vm4, %v453_v15, -1e+30 }
 0x233   : > { %v457_v19 = vsel %vm301_vm5, %v455_v17, -inf }
 0x234   : > { %458 = vmax.xlane.f32.xlu1 %v457_v19 }
 0x237   : > { %v450_v21 = vpop.f32.mrf.mxu1 }
 0x238   : > { %v454_v22 = vmul.f32 0.17677669, %v450_v21 }
 0x23a   : > { %v456_v23 = vsel %vm828_vm7, %v454_v22, -1e+30 }
 0x23b   : > { %v460_v25 = vsel %vm301_vm5, %v456_v23, -inf }
 0x23c   : > { %461 = vmax.xlane.f32.xlu1 %v460_v25 }
 0x244   : > { %387 = vadd.xlane.f32.xlu1 %v386_v27 }
 0x257   : > { %v391_v44 = vpop.xlane.xlu0 %390 }
 0x294   : > { %v541_v28 = vpop.xlane.xlu1 %540 }
 0x295   : > { %v545_v18 = vsub.f32 %v537_v6, %v541_v28 }
 0x297   : > { %v547_v29 = vmul.f32 1.442695, %v545_v18 }
 0x299   : > { %732 = vpow2.f32 %v547_v29 }
 0x29c   : > { %v544_v30 = vpop.xlane.xlu1 %543 }
 0x29d   : > { %v546_v32 = vsub.f32 %v538_v11, %v544_v30 }
 0x29f   : > { %v733_v33 = vpop.eup %732  ;;  %v549_v34 = vmul.f32 1.442695, %v546_v32 }
 0x2a0   : > { %v551_v24 = vsel %vm301_vm5, %v733_v33, 0.0 }
 0x2a1   : > { %734 = vpow2.f32 %v549_v34  ;;  %552 = vadd.xlane.f32.xlu1 %v551_v24 }
 0x2a7   : > { %v735_v35 = vpop.eup %734  ;;  %v459_v36 = vpop.xlane.xlu1 %458 }
 0x2a8   : > { %v463_v37 = vsub.f32 %v455_v17, %v459_v36  ;;  %v554_v38 = vsel %vm301_vm5, %v735_v35, 0.0 }
 0x2a9   : > { %555 = vadd.xlane.f32.xlu0 %v554_v38 }
 0x2aa   : > { %v465_v39 = vmul.f32 1.442695, %v463_v37 }
 0x2ac   : > { %736 = vpow2.f32 %v465_v39 }
 0x2af   : > { %v462_v40 = vpop.xlane.xlu1 %461 }
 0x2b0   : > { %v464_v41 = vsub.f32 %v456_v23, %v462_v40 }
 0x2b2   : > { %v737_v42 = vpop.eup %736  ;;  %v467_v43 = vmul.f32 1.442695, %v464_v41 }
 0x2b3   : > { %v469_v45 = vsel %vm301_vm5, %v737_v42, 0.0 }
 0x2b4   : > { %738 = vpow2.f32 %v467_v43  ;;  %470 = vadd.xlane.f32.xlu1 %v469_v45 }
 0x2b5   : > { %740 = vrcp.f32 %v391_v44 }
 0x2b7   : > { %v388_v46 = vpop.xlane.xlu1 %387 }
 0x2b8   : > { %742 = vrcp.f32 %v388_v46 }
 0x2ba   : > { %v739_v47 = vpop.eup %738 }
 0x2bb   : > { %v472_v48 = vsel %vm301_vm5, %v739_v47, 0.0  ;;  %v741_v49 = vpop.eup %740 }
 0x2bc   : > { %473 = vadd.xlane.f32.xlu0 %v472_v48  ;;  %v395_v53 = vmul.f32 %v741_v49, %v865_v1 }
 0x2be   : > { %v743_v51 = vpop.eup %742 }
 0x2bf   : > { %v394_v52 = vmul.f32 %v743_v51, %v731_v26 }
 0x2c1   : > { %v396_v54 = vpack.c.bf16 %v395_v53, %v394_v52 }
 0x2c3   : > { %697 = vmatmul.msk.bf16.vlgmr.msra.gmra.mxu3 %vm301_vm5, %v396_v54 }
 0x2cd   : > { %480 = vrot.lane.b32.xlu1 %v856_v50, %s763_s29 }
 0x2d0   : > { %562 = vrot.lane.b32.xlu0 %v856_v50, %s761_s25 }
 0x314   : > { %v553_v56 = vpop.xlane.xlu1 %552 }
 0x31c   : > { %v556_v55 = vpop.xlane.xlu0 %555 }
 0x327   : > { %v471_v58 = vpop.xlane.xlu1 %470 }
 0x32f   : > { %v474_v57 = vpop.xlane.xlu0 %473 }
 0x330   : > { %744 = vrcp.f32 %v474_v57 }
 0x331   : > { %746 = vrcp.f32 %v471_v58 }
 0x332   : > { %748 = vrcp.f32 %v556_v55 }
 0x333   : > { %750 = vrcp.f32 %v553_v56 }
 0x336   : > { %v745_v59 = vpop.eup %744 }
 0x337   : > { %v747_v60 = vpop.eup %746  ;;  %v478_v62 = vmul.f32 %v745_v59, %v739_v47 }
 0x338   : > { %v749_v61 = vpop.eup %748  ;;  %v477_v0 = vmul.f32 %v747_v60, %v737_v42 }
 0x339   : > { %v751_v63 = vpop.eup %750  ;;  %v560_v2 = vmul.f32 %v749_v61, %v735_v35 }
 0x33a   : > { %v479_v50 = vpack.c.bf16 %v478_v62, %v477_v0  ;;  %v559_v3 = vmul.f32 %v751_v63, %v733_v33 }
 0x33c   : > { %v561_v5 = vpack.c.bf16 %v560_v2, %v559_v3 }
 0x33f   : > { %v481_v1 = vpop.permute.xlu1 %480 }
 0x340   : > { %493 = vmatpush.bf16.msrb.mxu3 %v481_v1 }
 0x342   : > { %v563_v4 = vpop.permute.xlu0 %562 }
 0x343   : > { %699 = vmatmul.msk.bf16.vlgmr.msrb.gmra.mxu3 %vm301_vm5, %v479_v50  ;;  %575 = vmatpush.bf16.msrb.mxu2 %v563_v4 }
 0x346   : > { %v413_v6 = vpop.f32.mrf.mxu3  ;;  %701 = vmatmul.msk.bf16.vlgmr.msrb.gmra.mxu2 %vm301_vm5, %v561_v5 }
 0x347   : > { %420 = vrot.lane.b32.xlu2 %v413_v6, %s761_s25 }
 0x34e   : > { %v415_v7 = vpop.f32.mrf.mxu3 }
 0x34f   : > { %422 = vrot.lane.b32.xlu2 %v415_v7, %s761_s25 }
 0x3a1   : > { %v421_v8 = vpop.permute.xlu2 %420 }
 0x3a2   : > { %427 = vst.msk [vmem:[%s873_s9] sm:$0xff] %vm426_vm8, %v421_v8 }
 0x3a9   : > { %v423_v9 = vpop.permute.xlu2 %422 }
 0x3aa   : > { %428 = vst.msk [vmem:[%s873_s9 + $0x8] sm:$0xff] %vm426_vm8, %v423_v9 }
 0x3c6   : > { %v495_v10 = vpop.f32.mrf.mxu3 }
 0x3c7   : > { %502 = vrot.lane.b32.xlu2 %v495_v10, %s763_s29 }
 0x3c9   : > { %v577_v11 = vpop.f32.mrf.mxu2 }
 0x3ca   : > { %584 = vrot.lane.b32.xlu1 %v577_v11, %s760_s24 }
 0x3ce   : > { %v497_v12 = vpop.f32.mrf.mxu3 }
 0x3cf   : > { %504 = vrot.lane.b32.xlu0 %v497_v12, %s763_s29 }
 0x3d1   : > { %v579_v13 = vpop.f32.mrf.mxu2 }
 0x3d2   : > { %586 = vrot.lane.b32.xlu2 %v579_v13, %s760_s24 }
 0x421   : > { %v503_v14 = vpop.permute.xlu2 %502 }
 0x422   : > { %509 = vst.msk [vmem:[%s873_s9] sm:$0xff] %vm508_vm9, %v503_v14 }
 0x42c   : > { %v587_v17 = vpop.permute.xlu2 %586 }
 0x43c   : > { %v585_v15 = vpop.permute.xlu1 %584 }
 0x43d   : > { %591 = vst.msk [vmem:[%s873_s9] sm:$0xff] %vm590_vm10, %v585_v15 }
 0x441   : > { %v505_v16 = vpop.permute.xlu0 %504 }
 0x442   : > { %510 = vst.msk [vmem:[%s873_s9 + $0x8] sm:$0xff] %vm508_vm9, %v505_v16 }
 0x443   : > { %592 = vst.msk [vmem:[%s873_s9 + $0x8] sm:$0xff] %vm590_vm10, %v587_v17 }
 0x444 PF: > { %s14_s15 = sadd.s32 1, %s758_s15  }
 0x445   : > { %p11_p4 = scmp.ge.s32.totalorder %s14_s15, 4  }
 0x447   :  { %13 = sbr.rel (!%p11_p4) target bundleno = 1 (0x1), region = 75 }

// kernel: multimodal_forward.12
= control target key start
LH: loop header
LB: loop body
LE: loop exit
PB: predicated region body
PF: predicated region fallthrough
CT: control target
= control target key end

     0   :  { %v1028_v11 = vmov 128.0   ;;  %s1499_s0 = inlined_call_operand.vmem [shape: f32[32,128], index: 0, kind: input, shape index: {}]   ;;  %s1500_s1 = inlined_call_operand.vmem [shape: f32[1,128], index: 1, kind: input, shape index: {}]   ;;  %s1501_s2 = inlined_call_operand.vmem [shape: bf16[128,512], index: 2, kind: input, shape index: {}]   ;;  %s1502_s3 = inlined_call_operand.vmem [shape: bf16[256,128], index: 3, kind: input, shape index: {}]   ;;  %s1503_s4 = inlined_call_operand.vmem [shape: f32[32,128], index: 4, kind: output, shape index: {}]  }
   0x1   :  { %v1057_v0 = vld [vmem:[%s1499_s0 + $0x10] sm:$0xff]  ;;  %v1062_v1 = vld [vmem:[%s1499_s0] sm:$0xff]  ;;  %v1071_v4 = vld [vmem:[%s1499_s0 + $0x18] sm:$0xff]  ;;  %986 = vrcp.f32 %v1028_v11 }
   0x2   :  { %v23_v2 = vmul.f32 %v1057_v0, %v1057_v0  ;;  %v21_v3 = vmul.f32 %v1062_v1, %v1062_v1  ;;  %v1076_v5 = vld [vmem:[%s1499_s0 + $0x8] sm:$0xff]  ;;  %v24_v6 = vmul.f32 %v1071_v4, %v1071_v4  ;;  %v834_v8 = vld [vmem:[%s1501_s2 + $0xe0] sm:$0xf]  ;;  %v950_v9 = vld [vmem:[%s1501_s2 + $0xec] sm:$0xf0] }
   0x3   :  { %v22_v7 = vmul.f32 %v1076_v5, %v1076_v5  ;;  %v948_v10 = vld [vmem:[%s1501_s2 + $0xe4] sm:$0xf]  ;;  %v835_v12 = vor.u32 %v950_v9, %v834_v8  ;;  %v836_v13 = vld [vmem:[%s1501_s2 + $0xf0] sm:$0xf0]  ;;  %v842_v14 = vld [vmem:[%s1501_s2 + $0xe8] sm:$0xf] }
   0x4   :  { %29 = vadd.xlane.f32.xlu1 %v23_v2  ;;  %25 = vadd.xlane.f32.xlu0 %v21_v3  ;;  %v951_v15 = vld [vmem:[%s1501_s2 + $0xf4] sm:$0xf0]  ;;  %v839_v16 = vor.u32 %v948_v10, %v836_v13  ;;  %v949_v18 = vld [vmem:[%s1501_s2 + $0xec] sm:$0xf]  ;;  %v844_v19 = vld [vmem:[%s1501_s2 + $0xf8] sm:$0xf0] }
   0x5   :  { %v843_v17 = vor.u32 %v951_v15, %v842_v14  ;;  %294 = vmatpush.bf16.msra.mxu0 %v835_v12  ;;  %v847_v20 = vor.u32 %v949_v18, %v844_v19  ;;  %v818_v21 = vld [vmem:[%s1501_s2 + $0xc0] sm:$0xf]  ;;  %v946_v22 = vld [vmem:[%s1501_s2 + $0xcc] sm:$0xf0]  ;;  %v944_v23 = vld [vmem:[%s1501_s2 + $0xc4] sm:$0xf] }
   0x6   :  { %313 = vmatpush.bf16.msra.mxu1 %v839_v16  ;;  %v819_v24 = vor.u32 %v946_v22, %v818_v21  ;;  %v820_v25 = vld [vmem:[%s1501_s2 + $0xd0] sm:$0xf0]  ;;  %v826_v26 = vld [vmem:[%s1501_s2 + $0xc8] sm:$0xf]  ;;  %v947_v27 = vld [vmem:[%s1501_s2 + $0xd4] sm:$0xf0] }
   0x7   :  { %332 = vmatpush.bf16.msra.mxu2 %v843_v17  ;;  %351 = vmatpush.bf16.msra.mxu3 %v847_v20  ;;  %v823_v28 = vor.u32 %v944_v23, %v820_v25  ;;  %v827_v29 = vor.u32 %v947_v27, %v826_v26  ;;  %v945_v30 = vld [vmem:[%s1501_s2 + $0xcc] sm:$0xf]  ;;  %v828_v31 = vld [vmem:[%s1501_s2 + $0xd8] sm:$0xf0]  ;;  %v1130_v32 = vpop.eup %986  ;;  %v802_v34 = vld [vmem:[%s1501_s2 + $0xa0] sm:$0xf] }
   0x8   :  { %v831_v33 = vor.u32 %v945_v30, %v828_v31  ;;  %v942_v35 = vld [vmem:[%s1501_s2 + $0xac] sm:$0xf0]  ;;  %v940_v36 = vld [vmem:[%s1501_s2 + $0xa4] sm:$0xf]  ;;  %v804_v38 = vld [vmem:[%s1501_s2 + $0xb0] sm:$0xf0]  ;;  %vm38_vm0 = vweird.f32 %v1130_v32 }
   0x9   :  { %295 = vmatpush.bf16.msra.mxu0 %v819_v24  ;;  %v803_v37 = vor.u32 %v942_v35, %v802_v34  ;;  %v810_v39 = vld [vmem:[%s1501_s2 + $0xa8] sm:$0xf]  ;;  %v943_v40 = vld [vmem:[%s1501_s2 + $0xb4] sm:$0xf0]  ;;  %v34_v41 = vmul.f32 128.0, %v1130_v32  ;;  %v807_v42 = vor.u32 %v940_v36, %v804_v38 }
   0xa   :  { %314 = vmatpush.bf16.msra.mxu1 %v823_v28  ;;  %v811_v43 = vor.u32 %v943_v40, %v810_v39  ;;  %v941_v44 = vld [vmem:[%s1501_s2 + $0xac] sm:$0xf]  ;;  %v812_v45 = vld [vmem:[%s1501_s2 + $0xb8] sm:$0xf0]  ;;  %v786_v47 = vld [vmem:[%s1501_s2 + $0x80] sm:$0xf] }
   0xb   :  { %333 = vmatpush.bf16.msra.mxu2 %v827_v29  ;;  %352 = vmatpush.bf16.msra.mxu3 %v831_v33  ;;  %v815_v46 = vor.u32 %v941_v44, %v812_v45  ;;  %v938_v48 = vld [vmem:[%s1501_s2 + $0x8c] sm:$0xf0]  ;;  %v936_v49 = vld [vmem:[%s1501_s2 + $0x84] sm:$0xf]  ;;  %v788_v51 = vld [vmem:[%s1501_s2 + $0x90] sm:$0xf0] }
   0xc   :  { %31 = vadd.xlane.f32.xlu1 %v24_v6  ;;  %27 = vadd.xlane.f32.xlu0 %v22_v7  ;;  %v787_v50 = vor.u32 %v938_v48, %v786_v47  ;;  %v794_v52 = vld [vmem:[%s1501_s2 + $0x88] sm:$0xf]  ;;  %v939_v53 = vld [vmem:[%s1501_s2 + $0x94] sm:$0xf0]  ;;  %v35_v54 = vsub.f32 1.0, %v34_v41  ;;  %v791_v55 = vor.u32 %v936_v49, %v788_v51 }
   0xd   :  { %296 = vmatpush.bf16.msra.mxu0 %v803_v37  ;;  %v795_v56 = vor.u32 %v939_v53, %v794_v52  ;;  %v937_v57 = vld [vmem:[%s1501_s2 + $0x8c] sm:$0xf]  ;;  %v796_v58 = vld [vmem:[%s1501_s2 + $0x98] sm:$0xf0]  ;;  %v770_v60 = vld [vmem:[%s1501_s2 + $0x60] sm:$0xf] }
   0xe   :  { %315 = vmatpush.bf16.msra.mxu1 %v807_v42  ;;  %v799_v59 = vor.u32 %v937_v57, %v796_v58  ;;  %v934_v61 = vld [vmem:[%s1501_s2 + $0x6c] sm:$0xf0]  ;;  %v932_v62 = vld [vmem:[%s1501_s2 + $0x64] sm:$0xf]  ;;  %v772_v2 = vld [vmem:[%s1501_s2 + $0x70] sm:$0xf0]  ;;  %v36_v7 = vmul.f32 %v1130_v32, %v35_v54 }
   0xf   :  { %334 = vmatpush.bf16.msra.mxu2 %v811_v43  ;;  %353 = vmatpush.bf16.msra.mxu3 %v815_v46  ;;  %v771_v63 = vor.u32 %v934_v61, %v770_v60  ;;  %v778_v3 = vld [vmem:[%s1501_s2 + $0x68] sm:$0xf]  ;;  %v935_v6 = vld [vmem:[%s1501_s2 + $0x74] sm:$0xf0]  ;;  %v775_v8 = vor.u32 %v932_v62, %v772_v2  ;;  %v933_v10 = vld [vmem:[%s1501_s2 + $0x6c] sm:$0xf] }
  0x10   :  { %v779_v9 = vor.u32 %v935_v6, %v778_v3  ;;  %v780_v11 = vld [vmem:[%s1501_s2 + $0x78] sm:$0xf0]  ;;  %v754_v13 = vld [vmem:[%s1501_s2 + $0x40] sm:$0xf]  ;;  %v930_v14 = vld [vmem:[%s1501_s2 + $0x4c] sm:$0xf0]  ;;  %v37_v20 = vadd.f32 %v1130_v32, %v36_v7 }
  0x11   :  { %297 = vmatpush.bf16.msra.mxu0 %v787_v50  ;;  %v783_v12 = vor.u32 %v933_v10, %v780_v11  ;;  %v928_v15 = vld [vmem:[%s1501_s2 + $0x44] sm:$0xf]  ;;  %v755_v16 = vor.u32 %v930_v14, %v754_v13  ;;  %v756_v17 = vld [vmem:[%s1501_s2 + $0x50] sm:$0xf0]  ;;  %v762_v18 = vld [vmem:[%s1501_s2 + $0x48] sm:$0xf] }
  0x12   :  { %316 = vmatpush.bf16.msra.mxu1 %v791_v55  ;;  %v931_v19 = vld [vmem:[%s1501_s2 + $0x54] sm:$0xf0]  ;;  %v759_v21 = vor.u32 %v928_v15, %v756_v17  ;;  %v929_v23 = vld [vmem:[%s1501_s2 + $0x4c] sm:$0xf]  ;;  %v764_v24 = vld [vmem:[%s1501_s2 + $0x58] sm:$0xf0]  ;;  %v39_v34 = vsel %vm38_vm0, %v1130_v32, %v37_v20 }
  0x13   :  { %335 = vmatpush.bf16.msra.mxu2 %v795_v56  ;;  %354 = vmatpush.bf16.msra.mxu3 %v799_v59  ;;  %v763_v22 = vor.u32 %v931_v19, %v762_v18  ;;  %v767_v25 = vor.u32 %v929_v23, %v764_v24  ;;  %v738_v26 = vld [vmem:[%s1501_s2 + $0x20] sm:$0xf]  ;;  %v926_v27 = vld [vmem:[%s1501_s2 + $0x2c] sm:$0xf0]  ;;  %v924_v28 = vld [vmem:[%s1501_s2 + $0x24] sm:$0xf] }
  0x14   :  { %v739_v29 = vor.u32 %v926_v27, %v738_v26  ;;  %v740_v30 = vld [vmem:[%s1501_s2 + $0x30] sm:$0xf0]  ;;  %v746_v31 = vld [vmem:[%s1501_s2 + $0x28] sm:$0xf]  ;;  %v927_v33 = vld [vmem:[%s1501_s2 + $0x34] sm:$0xf0] }
  0x15   :  { %298 = vmatpush.bf16.msra.mxu0 %v771_v63  ;;  %v743_v35 = vor.u32 %v924_v28, %v740_v30  ;;  %v747_v36 = vor.u32 %v927_v33, %v746_v31  ;;  %v925_v37 = vld [vmem:[%s1501_s2 + $0x2c] sm:$0xf]  ;;  %v748_v38 = vld [vmem:[%s1501_s2 + $0x38] sm:$0xf0]  ;;  %v722_v32 = vld [vmem:[%s1501_s2] sm:$0xf] }
  0x16   :  { %317 = vmatpush.bf16.msra.mxu1 %v775_v8  ;;  %v751_v39 = vor.u32 %v925_v37, %v748_v38  ;;  %v922_v42 = vld [vmem:[%s1501_s2 + $0xc] sm:$0xf0]  ;;  %v920_v43 = vld [vmem:[%s1501_s2 + $0x4] sm:$0xf]  ;;  %v724_v46 = vld [vmem:[%s1501_s2 + $0x10] sm:$0xf0] }
  0x17   :  { %336 = vmatpush.bf16.msra.mxu2 %v779_v9  ;;  %355 = vmatpush.bf16.msra.mxu3 %v783_v12  ;;  %v723_v45 = vor.u32 %v922_v42, %v722_v32  ;;  %v730_v47 = vld [vmem:[%s1501_s2 + $0x8] sm:$0xf]  ;;  %v923_v48 = vld [vmem:[%s1501_s2 + $0x14] sm:$0xf0]  ;;  %v727_v49 = vor.u32 %v920_v43, %v724_v46  ;;  %v921_v51 = vld [vmem:[%s1501_s2 + $0xc] sm:$0xf] }
  0x18   :  { %v731_v50 = vor.u32 %v923_v48, %v730_v47  ;;  %v732_v52 = vld [vmem:[%s1501_s2 + $0x18] sm:$0xf0]  ;;  %v985_v24 = vld [vmem:[%s1500_s1] ss:$0 sm:$0xff]  ;;  %v957_v46 = vld [vmem:[%s1502_s3 + $0x28] sm:$0xff] }
  0x19   :  { %299 = vmatpush.bf16.msra.mxu0 %v755_v16  ;;  %v735_v54 = vor.u32 %v921_v51, %v732_v52  ;;  %v959_v42 = vld [vmem:[%s1502_s3 + $0x38] sm:$0xff]  ;;  %v965_v47 = vld [vmem:[%s1502_s3 + $0x68] sm:$0xff]  ;;  %v956_v48 = vld [vmem:[%s1502_s3 + $0x20] sm:$0xff] }
  0x1a   :  { %318 = vmatpush.bf16.msra.mxu1 %v759_v21  ;;  %v967_v43 = vld [vmem:[%s1502_s3 + $0x78] sm:$0xff] }
  0x1b   :  { %337 = vmatpush.bf16.msra.mxu2 %v763_v22  ;;  %356 = vmatpush.bf16.msra.mxu3 %v767_v25 }
  0x1d   :  { %300 = vmatpush.bf16.msra.mxu0 %v739_v29 }
  0x1e   :  { %319 = vmatpush.bf16.msra.mxu1 %v743_v35 }
  0x1f   :  { %338 = vmatpush.bf16.msra.mxu2 %v747_v36  ;;  %357 = vmatpush.bf16.msra.mxu3 %v751_v39 }
  0x21   :  { %301 = vmatpush.bf16.msra.mxu0 %v723_v45  ;;  %v966_v45 = vld [vmem:[%s1502_s3 + $0x70] sm:$0xff] }
  0x22   :  { %320 = vmatpush.bf16.msra.mxu1 %v727_v49  ;;  %v964_v49 = vld [vmem:[%s1502_s3 + $0x60] sm:$0xff] }
  0x23   :  { %339 = vmatpush.bf16.msra.mxu2 %v731_v50  ;;  %358 = vmatpush.bf16.msra.mxu3 %v735_v54  ;;  %v955_v54 = vld [vmem:[%s1502_s3 + $0x18] sm:$0xff] }
  0x25   :  { %670 = vmatpush.bf16.msrb.mxu0 %v959_v42 }
  0x26   :  { %689 = vmatpush.bf16.msrb.mxu1 %v967_v43 }
  0x27   :  { %968 = vmatpush.bf16.msrb.mxu2 %v959_v42  ;;  %976 = vmatpush.bf16.msrb.mxu3 %v967_v43 }
  0x2a   :  { %690 = vmatpush.bf16.msrb.mxu1 %v966_v45 }
  0x2b   :  { %977 = vmatpush.bf16.msrb.mxu3 %v966_v45 }
  0x2e   :  { %691 = vmatpush.bf16.msrb.mxu1 %v965_v47 }
  0x2f   :  { %978 = vmatpush.bf16.msrb.mxu3 %v965_v47 }
  0x32   :  { %692 = vmatpush.bf16.msrb.mxu1 %v964_v49 }
  0x33   :  { %979 = vmatpush.bf16.msrb.mxu3 %v964_v49 }
  0x77   :  { %v30_v40 = vpop.xlane.xlu1 %29  ;;  %v26_v41 = vpop.xlane.xlu0 %25 }
  0x78   :  { %v40_v44 = vmul.f32 %v39_v34, %v26_v41  ;;  %v42_v55 = vmul.f32 %v39_v34, %v30_v40 }
  0x7a   :  { %v44_v53 = vadd.f32 1e-06, %v40_v44  ;;  %v46_v56 = vadd.f32 1e-06, %v42_v55  ;;  %v958_v44 = vld [vmem:[%s1502_s3 + $0x30] sm:$0xff]  ;;  %v963_v55 = vld [vmem:[%s1502_s3 + $0x58] sm:$0xff] }
  0x7b   :  { %671 = vmatpush.bf16.msrb.mxu0 %v958_v44  ;;  %969 = vmatpush.bf16.msrb.mxu2 %v958_v44 }
  0x7c   :  { %988 = vrsqrt.f32 %v44_v53  ;;  %vm54_vm2 = vweird.f32 %v44_v53  ;;  %vm74_vm9 = vweird.f32 %v46_v56  ;;  %693 = vmatpush.bf16.msrb.mxu1 %v963_v55  ;;  %980 = vmatpush.bf16.msrb.mxu3 %v963_v55 }
  0x7d   :  { %990 = vrsqrt.f32 %v46_v56 }
  0x7f   :  { %v32_v57 = vpop.xlane.xlu1 %31  ;;  %v28_v58 = vpop.xlane.xlu0 %27  ;;  %672 = vmatpush.bf16.msrb.mxu0 %v957_v46  ;;  %970 = vmatpush.bf16.msrb.mxu2 %v957_v46 }
  0x80   :  { %v43_v59 = vmul.f32 %v39_v34, %v32_v57  ;;  %v41_v60 = vmul.f32 %v39_v34, %v28_v58  ;;  %v962_v57 = vld [vmem:[%s1502_s3 + $0x50] sm:$0xff] }
  0x81   :  { %694 = vmatpush.bf16.msrb.mxu1 %v962_v57  ;;  %981 = vmatpush.bf16.msrb.mxu3 %v962_v57 }
  0x82   :  { %v47_v61 = vadd.f32 1e-06, %v43_v59  ;;  %v45_v62 = vadd.f32 1e-06, %v41_v60  ;;  %v989_v63 = vpop.eup %988 }
  0x83   :  { %v49_v2 = vmul.f32 %v989_v63, %v44_v53  ;;  %v991_v7 = vpop.eup %990  ;;  %vm55_vm1 = vweird.f32 %v989_v63  ;;  %673 = vmatpush.bf16.msrb.mxu0 %v956_v48  ;;  %971 = vmatpush.bf16.msrb.mxu2 %v956_v48 }
  0x84   :  { %992 = vrsqrt.f32 %v47_v61  ;;  %v69_v13 = vmul.f32 %v991_v7, %v46_v56  ;;  %vm56_vm3 = vmor %vm54_vm2, %vm55_vm1  ;;  %vm64_vm5 = vweird.f32 %v45_v62  ;;  %vm84_vm7 = vweird.f32 %v47_v61  ;;  %v954_v56 = vld [vmem:[%s1502_s3 + $0x10] sm:$0xff] }
  0x85   :  { %994 = vrsqrt.f32 %v45_v62  ;;  %v50_v3 = vmul.f32 %v989_v63, %v49_v2  ;;  %vm75_vm10 = vweird.f32 %v991_v7 }
  0x86   :  { %v70_v18 = vmul.f32 %v991_v7, %v69_v13  ;;  %vm76_vm12 = vmor %vm74_vm9, %vm75_vm10 }
  0x87   :  { %v51_v6 = vmul.f32 0.5, %v50_v3  ;;  %674 = vmatpush.bf16.msrb.mxu0 %v955_v54  ;;  %972 = vmatpush.bf16.msrb.mxu2 %v955_v54 }
  0x88   :  { %v71_v25 = vmul.f32 0.5, %v70_v18 }
  0x89   :  { %v52_v9 = vsub.f32 1.5, %v51_v6  ;;  %v953_v6 = vld [vmem:[%s1502_s3 + $0x8] sm:$0xff] }
  0x8a   :  { %v993_v8 = vpop.eup %992  ;;  %v72_v31 = vsub.f32 1.5, %v71_v25 }
  0x8b   :  { %v995_v10 = vpop.eup %994  ;;  %v79_v11 = vmul.f32 %v993_v8, %v47_v61  ;;  %v53_v14 = vmul.f32 %v989_v63, %v52_v9  ;;  %vm85_vm8 = vweird.f32 %v993_v8  ;;  %675 = vmatpush.bf16.msrb.mxu0 %v954_v56  ;;  %973 = vmatpush.bf16.msrb.mxu2 %v954_v56  ;;  %v960_v9 = vld [vmem:[%s1502_s3 + $0x40] sm:$0xff] }
  0x8c   :  { %v59_v12 = vmul.f32 %v995_v10, %v45_v62  ;;  %vm65_vm4 = vweird.f32 %v995_v10  ;;  %vm86_vm11 = vmor %vm84_vm7, %vm85_vm8  ;;  %v73_v35 = vmul.f32 %v991_v7, %v72_v31 }
  0x8d   :  { %v80_v16 = vmul.f32 %v993_v8, %v79_v11  ;;  %v57_v19 = vsel %vm56_vm3, %v989_v63, %v53_v14  ;;  %vm66_vm6 = vmor %vm64_vm5, %vm65_vm4 }
  0x8e   :  { %v60_v15 = vmul.f32 %v995_v10, %v59_v12  ;;  %v88_v23 = vmul.f32 %v57_v19, %v1062_v1  ;;  %v77_v37 = vsel %vm76_vm12, %v991_v7, %v73_v35  ;;  %v961_v7 = vld [vmem:[%s1502_s3 + $0x48] sm:$0xff] }
  0x8f   :  { %v81_v21 = vmul.f32 0.5, %v80_v16  ;;  %v90_v39 = vmul.f32 %v77_v37, %v1057_v0  ;;  %676 = vmatpush.bf16.msrb.mxu0 %v953_v6  ;;  %695 = vmatpush.bf16.msrb.mxu1 %v961_v7 }
  0x90   :  { %v61_v17 = vmul.f32 0.5, %v60_v15  ;;  %v96_v29 = vmul.f32 %v985_v24, %v88_v23  ;;  %974 = vmatpush.bf16.msrb.mxu2 %v953_v6  ;;  %982 = vmatpush.bf16.msrb.mxu3 %v961_v7 }
  0x91   :  { %v82_v28 = vsub.f32 1.5, %v81_v21  ;;  %v98_v41 = vmul.f32 %v985_v24, %v90_v39 }
  0x92   :  { %v62_v20 = vsub.f32 1.5, %v61_v17 }
  0x93   :  { %v83_v34 = vmul.f32 %v993_v8, %v82_v28  ;;  %696 = vmatpush.bf16.msrb.mxu1 %v960_v9 }
  0x94   :  { %v63_v22 = vmul.f32 %v995_v10, %v62_v20  ;;  %983 = vmatpush.bf16.msrb.mxu3 %v960_v9 }
  0x95   :  { %v87_v36 = vsel %vm86_vm11, %v993_v8, %v83_v34  ;;  %v952_v8 = vld [vmem:[%s1502_s3] sm:$0xff] }
  0x96   :  { %v67_v26 = vsel %vm66_vm6, %v995_v10, %v63_v22  ;;  %v91_v38 = vmul.f32 %v87_v36, %v1071_v4  ;;  %677 = vmatpush.bf16.msrb.mxu0 %v952_v8  ;;  %975 = vmatpush.bf16.msrb.mxu2 %v952_v8 }
  0x97   :  { %v89_v27 = vmul.f32 %v67_v26, %v1076_v5 }
  0x98   :  { %v99_v40 = vmul.f32 %v985_v24, %v91_v38 }
  0x99   :  { %v97_v30 = vmul.f32 %v985_v24, %v89_v27 }
  0x9a   :  { %v101_v32 = vpack.c.bf16 %v99_v40, %v98_v41 }
  0x9b   :  { %v100_v33 = vpack.c.bf16 %v97_v30, %v96_v29 }
  0x9d   :  { %302 = vmatmul.bf16.vlgmr.msra.gmra.mxu0 %v100_v33  ;;  %321 = vmatmul.bf16.vlgmr.msra.gmra.mxu1 %v100_v33 }
  0x9e   :  { %340 = vmatmul.bf16.vlgmr.msra.gmra.mxu2 %v100_v33  ;;  %359 = vmatmul.bf16.vlgmr.msra.gmra.mxu3 %v100_v33 }
  0xad   :  { %307 = vmatmul.bf16.gmra.mxu0 %v101_v32  ;;  %326 = vmatmul.bf16.gmra.mxu1 %v101_v32 }
  0xae   :  { %345 = vmatmul.bf16.gmra.mxu2 %v101_v32  ;;  %364 = vmatmul.bf16.gmra.mxu3 %v101_v32 }
 0x11a   :  { %v1312_v50 = vpop.f32.mrf.mxu0  ;;  %v1314_v51 = vpop.f32.mrf.mxu1 }
 0x11b   :  { %v848_v52 = vmul.f32 -1.442695, %v1312_v50  ;;  %v849_v53 = vmul.f32 -1.442695, %v1314_v51 }
 0x11d   :  { %996 = vpow2.f32 %v848_v52 }
 0x11e   :  { %998 = vpow2.f32 %v849_v53 }
 0x121   :  { %v1374_v27 = vpop.f32.mrf.mxu2  ;;  %v360_v56 = vpop.f32.mrf.mxu3 }
 0x122   :  { %v1330_v58 = vpop.f32.mrf.mxu0  ;;  %v1332_v59 = vpop.f32.mrf.mxu1 }
 0x123   :  { %v997_v60 = vpop.eup %996  ;;  %v850_v61 = vmul.f32 -1.442695, %v1330_v58  ;;  %v851_v2 = vmul.f32 -1.442695, %v1332_v59 }
 0x124   :  { %v999_v62 = vpop.eup %998  ;;  %v1335_v63 = vadd.f32 1.0, %v997_v60 }
 0x125   :  { %v1338_v3 = vadd.f32 1.0, %v999_v62  ;;  %1000 = vpow2.f32 %v850_v61 }
 0x126   :  { %1002 = vrcp.f32 %v1335_v63  ;;  %v411_v25 = vand.u32 2147483647, %v1335_v63  ;;  %vm407_vm13 = vweird.f32 %v1335_v63  ;;  %v413_v31 = vand.u32 2147483648, %v1335_v63 }
 0x127   :  { %1004 = vrcp.f32 %v1338_v3  ;;  %vm422_vm15 = vweird.f32 %v1338_v3  ;;  %v426_v36 = vand.u32 2147483647, %v1338_v3  ;;  %v428_v37 = vand.u32 2147483648, %v1338_v3 }
 0x128   :  { %1006 = vpow2.f32 %v851_v2  ;;  %vm1387_vm0 = vcmp.eq.f32.partialorder %v411_v25, 8.507059e+37  ;;  %v414_v47 = vor.u32 1.1754944e-38, %v413_v31 }
 0x129   :  { %vm1406_vm3 = vcmp.eq.f32.partialorder %v426_v36, 8.507059e+37  ;;  %v429_v53 = vor.u32 1.1754944e-38, %v428_v37  ;;  %v362_v39 = vpop.f32.mrf.mxu3 }
 0x12a   :  { %v1354_v10 = vpop.f32.mrf.mxu0  ;;  %v1356_v11 = vpop.f32.mrf.mxu1 }
 0x12b   :  { %v1001_v12 = vpop.eup %1000  ;;  %v852_v13 = vmul.f32 -1.442695, %v1354_v10  ;;  %v853_v16 = vmul.f32 -1.442695, %v1356_v11 }
 0x12c   :  { %v1003_v14 = vpop.eup %1002  ;;  %v1359_v15 = vadd.f32 1.0, %v1001_v12 }
 0x12d   :  { %v1362_v17 = vpop.eup %1004  ;;  %v403_v18 = vmul.f32 %v1003_v14, %v1335_v63  ;;  %1008 = vpow2.f32 %v852_v13  ;;  %vm408_vm14 = vweird.f32 %v1003_v14 }
 0x12e   :  { %v1007_v19 = vpop.eup %1006  ;;  %v418_v20 = vmul.f32 %v1362_v17, %v1338_v3  ;;  %1010 = vrcp.f32 %v1359_v15  ;;  %v441_v41 = vand.u32 2147483647, %v1359_v15  ;;  %vm1395_vm1 = vmor %vm407_vm13, %vm408_vm14  ;;  %vm423_vm2 = vweird.f32 %v1362_v17 }
 0x12f   :  { %v404_v21 = vsub.f32 1.0, %v403_v18  ;;  %v1368_v22 = vadd.f32 1.0, %v1007_v19  ;;  %1012 = vpow2.f32 %v853_v16  ;;  %v443_v49 = vand.u32 2147483648, %v1359_v15  ;;  %vm1414_vm5 = vmor %vm422_vm15, %vm423_vm2 }
 0x130   :  { %v419_v23 = vsub.f32 1.0, %v418_v20  ;;  %vm437_vm4 = vweird.f32 %v1359_v15  ;;  %vm1418_vm7 = vcmp.eq.f32.partialorder %v441_v41, 8.507059e+37 }
 0x131   :  { %v405_v24 = vmul.f32 %v1003_v14, %v404_v21  ;;  %1014 = vrcp.f32 %v1368_v22  ;;  %v444_v7 = vor.u32 1.1754944e-38, %v443_v49  ;;  %v458_v8 = vand.u32 2147483648, %v1368_v22 }
 0x132   :  { %v420_v26 = vmul.f32 %v1362_v17, %v419_v23  ;;  %v1376_v28 = vpop.f32.mrf.mxu0  ;;  %v1380_v34 = vpop.f32.mrf.mxu1  ;;  %v456_v13 = vand.u32 2147483647, %v1368_v22  ;;  %vm452_vm10 = vweird.f32 %v1368_v22 }
 0x133   :  { %v1009_v29 = vpop.eup %1008  ;;  %v406_v30 = vadd.f32 %v1003_v14, %v405_v24  ;;  %v854_v33 = vmul.f32 -1.442695, %v1376_v28  ;;  %v855_v44 = vmul.f32 -1.442695, %v1380_v34  ;;  %v459_v24 = vor.u32 1.1754944e-38, %v458_v8  ;;  %v365_v8 = vpop.f32.mrf.mxu3 }
 0x134   :  { %v1011_v35 = vpop.eup %1010  ;;  %v1385_v38 = vadd.f32 1.0, %v1009_v29  ;;  %v421_v43 = vadd.f32 %v1362_v17, %v420_v26  ;;  %vm457_vm12 = vcmp.eq.f32.partialorder %v456_v13, 8.507059e+37 }
 0x135   :  { %v433_v40 = vmul.f32 %v1011_v35, %v1359_v15  ;;  %1016 = vpow2.f32 %v854_v33  ;;  %v1013_v32 = vpop.eup %1012  ;;  %v410_v46 = vsel %vm1395_vm1, %v1003_v14, %v406_v30  ;;  %vm438_vm6 = vweird.f32 %v1011_v35  ;;  %v343_v14 = vpop.f32.mrf.mxu2 }
 0x136   :  { %1018 = vrcp.f32 %v1385_v38  ;;  %v1422_v61 = vadd.f32 1.0, %v1013_v32  ;;  %v415_v62 = vsel %vm1387_vm0, %v414_v47, %v410_v46  ;;  %v425_v63 = vsel %vm1414_vm5, %v1362_v17, %v421_v43  ;;  %vm439_vm8 = vmor %vm437_vm4, %vm438_vm6 }
 0x137   :  { %v1015_v45 = vpop.eup %1014  ;;  %v434_v48 = vsub.f32 1.0, %v433_v40  ;;  %1020 = vpow2.f32 %v855_v44  ;;  %v522_v17 = vmul.f32 %v415_v62, %v1312_v50  ;;  %v430_v18 = vsel %vm1406_vm3, %v429_v53, %v425_v63 }
 0x138   :  { %v448_v54 = vmul.f32 %v1015_v45, %v1368_v22  ;;  %1022 = vrcp.f32 %v1422_v61  ;;  %vm453_vm9 = vweird.f32 %v1015_v45  ;;  %v523_v26 = vmul.f32 %v430_v18, %v1314_v51 }
 0x139   :  { %v435_v57 = vmul.f32 %v1011_v35, %v434_v48  ;;  %vm454_vm11 = vmor %vm452_vm10, %vm453_vm9  ;;  %v530_v31 = vmul.f32 %v522_v17, %v1374_v27  ;;  %v473_v43 = vand.u32 2147483648, %v1385_v38  ;;  %vm467_vm14 = vweird.f32 %v1385_v38 }
 0x13a   :  { %v449_v2 = vsub.f32 1.0, %v448_v54  ;;  %v531_v32 = vmul.f32 %v523_v26, %v360_v56  ;;  %v471_v44 = vand.u32 2147483647, %v1385_v38  ;;  %v488_v60 = vand.u32 2147483648, %v1422_v61 }
 0x13b   :  { %v1017_v3 = vpop.eup %1016  ;;  %v436_v6 = vadd.f32 %v1011_v35, %v435_v57  ;;  %v474_v52 = vor.u32 1.1754944e-38, %v473_v43  ;;  %vm482_vm4 = vweird.f32 %v1422_v61  ;;  %v486_v63 = vand.u32 2147483647, %v1422_v61 }
 0x13c   :  { %v1019_v9 = vpop.eup %1018  ;;  %v450_v12 = vmul.f32 %v1015_v45, %v449_v2  ;;  %v1434_v16 = vadd.f32 1.0, %v1017_v3  ;;  %vm472_vm0 = vcmp.eq.f32.partialorder %v471_v44, 8.507059e+37 }
 0x13d   :  { %v440_v19 = vsel %vm439_vm8, %v1011_v35, %v436_v6  ;;  %v463_v20 = vmul.f32 %v1019_v9, %v1385_v38  ;;  %v1021_v50 = vpop.eup %1020  ;;  %vm468_vm13 = vweird.f32 %v1019_v9  ;;  %v346_v47 = vpop.f32.mrf.mxu2  ;;  %vm487_vm8 = vcmp.eq.f32.partialorder %v486_v63, 8.507059e+37 }
 0x13e   :  { %v445_v21 = vsel %vm1418_vm7, %v444_v7, %v440_v19  ;;  %v451_v15 = vadd.f32 %v1015_v45, %v450_v12  ;;  %1024 = vrcp.f32 %v1434_v16  ;;  %v1446_v30 = vpop.eup %1022  ;;  %v1452_v41 = vadd.f32 1.0, %v1021_v50  ;;  %vm469_vm15 = vmor %vm467_vm14, %vm468_vm13 }
 0x13f   :  { %v524_v23 = vmul.f32 %v445_v21, %v1330_v58  ;;  %v464_v25 = vsub.f32 1.0, %v463_v20  ;;  %v478_v58 = vmul.f32 %v1446_v30, %v1422_v61  ;;  %v503_v53 = vand.u32 2147483648, %v1434_v16 }
 0x140   :  { %v455_v29 = vsel %vm454_vm11, %v1015_v45, %v451_v15  ;;  %1026 = vrcp.f32 %v1452_v41  ;;  %v501_v38 = vand.u32 2147483647, %v1434_v16  ;;  %vm483_vm2 = vweird.f32 %v1446_v30 }
 0x141   :  { %v460_v33 = vsel %vm457_vm12, %v459_v24, %v455_v29  ;;  %v532_v35 = vmul.f32 %v524_v23, %v343_v14  ;;  %v465_v36 = vmul.f32 %v1019_v9, %v464_v25  ;;  %v479_v27 = vsub.f32 1.0, %v478_v58  ;;  %vm1470_vm6 = vmor %vm482_vm4, %vm483_vm2 }
 0x142   :  { %v525_v22 = vmul.f32 %v460_v33, %v1332_v59  ;;  %vm497_vm3 = vweird.f32 %v1434_v16  ;;  %v504_v2 = vor.u32 1.1754944e-38, %v503_v53  ;;  %vm502_vm7 = vcmp.eq.f32.partialorder %v501_v38, 8.507059e+37 }
 0x143   :  { %v538_v37 = vpack.c.bf16 %v532_v35, %v530_v31  ;;  %v466_v40 = vadd.f32 %v1019_v9, %v465_v36  ;;  %v480_v46 = vmul.f32 %v1446_v30, %v479_v27  ;;  %v489_v61 = vor.u32 1.1754944e-38, %v488_v60 }
 0x144   :  { %v1025_v51 = vpop.eup %1024  ;;  %v533_v42 = vmul.f32 %v525_v22, %v362_v39  ;;  %v518_v17 = vand.u32 2147483648, %v1452_v41  ;;  %v516_v18 = vand.u32 2147483647, %v1452_v41  ;;  %vm512_vm10 = vweird.f32 %v1452_v41 }
 0x145   :  { %v493_v59 = vmul.f32 %v1025_v51, %v1434_v16  ;;  %678 = vmatmul.bf16.vlgmr.msrb.gmra.mxu0 %v538_v37  ;;  %v470_v48 = vsel %vm469_vm15, %v1019_v9, %v466_v40  ;;  %vm498_vm1 = vweird.f32 %v1025_v51  ;;  %v481_v56 = vadd.f32 %v1446_v30, %v480_v46  ;;  %v348_v19 = vpop.f32.mrf.mxu2 }
 0x146   :  { %v539_v45 = vpack.c.bf16 %v533_v42, %v531_v32  ;;  %v475_v55 = vsel %vm472_vm0, %v474_v52, %v470_v48  ;;  %v1027_v57 = vpop.eup %1026  ;;  %vm499_vm5 = vmor %vm497_vm3, %vm498_vm1  ;;  %v519_v24 = vor.u32 1.1754944e-38, %v518_v17  ;;  %vm517_vm12 = vcmp.eq.f32.partialorder %v516_v18, 8.507059e+37 }
 0x147   :  { %v494_v49 = vsub.f32 1.0, %v493_v59  ;;  %v508_v3 = vmul.f32 %v1027_v57, %v1452_v41  ;;  %v526_v6 = vmul.f32 %v475_v55, %v1354_v10  ;;  %v485_v12 = vsel %vm1470_vm6, %v1446_v30, %v481_v56  ;;  %v367_v30 = vpop.f32.mrf.mxu3 }
 0x148   :  { %697 = vmatmul.bf16.vlgmr.msrb.gmra.mxu1 %v539_v45  ;;  %vm513_vm9 = vweird.f32 %v1027_v57  ;;  %v490_v20 = vsel %vm487_vm8, %v489_v61, %v485_v12 }
 0x149   :  { %v495_v54 = vmul.f32 %v1025_v51, %v494_v49  ;;  %v509_v14 = vsub.f32 1.0, %v508_v3  ;;  %v534_v21 = vmul.f32 %v526_v6, %v346_v47  ;;  %vm514_vm11 = vmor %vm512_vm10, %vm513_vm9  ;;  %v527_v50 = vmul.f32 %v490_v20, %v1356_v11 }
 0x14b   :  { %v496_v62 = vadd.f32 %v1025_v51, %v495_v54  ;;  %v510_v10 = vmul.f32 %v1027_v57, %v509_v14  ;;  %v535_v31 = vmul.f32 %v527_v50, %v365_v8 }
 0x14d   :  { %v500_v9 = vsel %vm499_vm5, %v1025_v51, %v496_v62  ;;  %v511_v23 = vadd.f32 %v1027_v57, %v510_v10 }
 0x14e   :  { %v505_v13 = vsel %vm502_vm7, %v504_v2, %v500_v9 }
 0x14f   :  { %v528_v16 = vmul.f32 %v505_v13, %v1376_v28  ;;  %v515_v28 = vsel %vm514_vm11, %v1027_v57, %v511_v23 }
 0x150   :  { %v520_v26 = vsel %vm517_vm12, %v519_v24, %v515_v28 }
 0x151   :  { %v536_v15 = vmul.f32 %v528_v16, %v348_v19  ;;  %v529_v29 = vmul.f32 %v520_v26, %v1380_v34 }
 0x153   :  { %v540_v25 = vpack.c.bf16 %v536_v15, %v534_v21  ;;  %v537_v33 = vmul.f32 %v529_v29, %v367_v30 }
 0x155   :  { %683 = vmatmul.bf16.vlgmr.msrb.gmra.mxu2 %v540_v25  ;;  %v541_v35 = vpack.c.bf16 %v537_v33, %v535_v31 }
 0x157   :  { %702 = vmatmul.bf16.vlgmr.msrb.gmra.mxu3 %v541_v35 }
 0x1c2   :  { %v679_v36 = vpop.f32.mrf.mxu0 }
 0x1c5   :  { %v698_v22 = vpop.f32.mrf.mxu1 }
 0x1c6   :  { %v699_v58 = vadd.f32 %v698_v22, %v679_v36 }
 0x1c8   :  { %v708_v37 = vadd.f32 %v699_v58, %v1062_v1 }
 0x1ca   :  { %712 = vst [vmem:[%s1503_s4] sm:$0xff] %v708_v37  ;;  %v681_v11 = vpop.f32.mrf.mxu0 }
 0x1cd   :  { %v700_v39 = vpop.f32.mrf.mxu1 }
 0x1ce   :  { %v701_v40 = vadd.f32 %v700_v39, %v681_v11 }
 0x1d0   :  { %v709_v41 = vadd.f32 %v701_v40, %v1076_v5 }
 0x1d2   :  { %713 = vst [vmem:[%s1503_s4 + $0x8] sm:$0xff] %v709_v41 }
 0x1d8   :  { %v684_v34 = vpop.f32.mrf.mxu2 }
 0x1da   :  { %v703_v51 = vpop.f32.mrf.mxu3 }
 0x1db   :  { %v704_v32 = vadd.f32 %v703_v51, %v684_v34 }
 0x1dd   :  { %v710_v42 = vadd.f32 %v704_v32, %v1057_v0 }
 0x1df   :  { %714 = vst [vmem:[%s1503_s4 + $0x10] sm:$0xff] %v710_v42 }
 0x1e0   :  { %v686_v1 = vpop.f32.mrf.mxu2 }
 0x1e2   :  { %v705_v43 = vpop.f32.mrf.mxu3 }
 0x1e3   :  { %v706_v27 = vadd.f32 %v705_v43, %v686_v1 }
 0x1e5   :  { %v711_v44 = vadd.f32 %v706_v27, %v1071_v4 }
 0x1e7   :  { %715 = vst [vmem:[%s1503_s4 + $0x18] sm:$0xff] %v711_v44 }

// kernel: multimodal_forward.13
= control target key start
LH: loop header
LB: loop body
LE: loop exit
PB: predicated region body
PF: predicated region fallthrough
CT: control target
= control target key end

     0   :  { %v536_v11 = vmov 128.0   ;;  %vm374_vm2 = vcmask 7168   ;;  %s867_s0 = inlined_call_operand.vmem [shape: f32[32,128], index: 0, kind: input, shape index: {}]   ;;  %s868_s1 = inlined_call_operand.vmem [shape: f32[1,128], index: 1, kind: input, shape index: {}]   ;;  %s869_s2 = inlined_call_operand.vmem [shape: bf16[128,256], index: 2, kind: input, shape index: {}]   ;;  %s870_s3 = inlined_call_operand.vmem [shape: s32[32,1], index: 3, kind: input, shape index: {}]   ;;  %s871_s6 = inlined_call_operand.vmem [shape: f32[32,1], index: 6, kind: output, shape index: {2}]   ;;  %s872_s4 = inlined_call_operand.vmem [shape: f32[32,256], index: 4, kind: output, shape index: {0}]   ;;  %s873_s5 = inlined_call_operand.vmem [shape: f32[32,1], index: 5, kind: output, shape index: {1}]  }
   0x1   :  { %v577_v0 = vld [vmem:[%s867_s0 + $0x10] sm:$0xff]  ;;  %v582_v1 = vld [vmem:[%s867_s0] sm:$0xff]  ;;  %v591_v4 = vld [vmem:[%s867_s0 + $0x18] sm:$0xff]  ;;  %502 = vrcp.f32 %v536_v11 }
   0x2   :  { %v26_v2 = vmul.f32 %v577_v0, %v577_v0  ;;  %v24_v3 = vmul.f32 %v582_v1, %v582_v1  ;;  %v596_v5 = vld [vmem:[%s867_s0 + $0x8] sm:$0xff]  ;;  %v27_v6 = vmul.f32 %v591_v4, %v591_v4  ;;  %v453_v8 = vld [vmem:[%s869_s2 + $0x70] sm:$0xf]  ;;  %v478_v9 = vld [vmem:[%s869_s2 + $0x74] sm:$0xf0] }
   0x3   :  { %v25_v7 = vmul.f32 %v596_v5, %v596_v5  ;;  %v477_v10 = vld [vmem:[%s869_s2 + $0x74] sm:$0xf]  ;;  %v454_v12 = vor.u32 %v478_v9, %v453_v8  ;;  %v455_v13 = vld [vmem:[%s869_s2 + $0x78] sm:$0xf0]  ;;  %v445_v15 = vld [vmem:[%s869_s2 + $0x60] sm:$0xf] }
   0x4   :  { %32 = vadd.xlane.f32.xlu0 %v26_v2  ;;  %28 = vadd.xlane.f32.xlu1 %v24_v3  ;;  %v458_v14 = vor.u32 %v477_v10, %v455_v13  ;;  %v476_v16 = vld [vmem:[%s869_s2 + $0x64] sm:$0xf0]  ;;  %v475_v17 = vld [vmem:[%s869_s2 + $0x64] sm:$0xf]  ;;  %v447_v19 = vld [vmem:[%s869_s2 + $0x68] sm:$0xf0] }
   0x5   :  { %201 = vmatpush.bf16.msra.mxu0 %v454_v12  ;;  %479 = vmatpush.bf16.msra.mxu2 %v454_v12  ;;  %v446_v18 = vor.u32 %v476_v16, %v445_v15  ;;  %v450_v20 = vor.u32 %v475_v17, %v447_v19  ;;  %v437_v22 = vld [vmem:[%s869_s2 + $0x50] sm:$0xf]  ;;  %v474_v23 = vld [vmem:[%s869_s2 + $0x54] sm:$0xf0]  ;;  %v473_v24 = vld [vmem:[%s869_s2 + $0x54] sm:$0xf] }
   0x6   :  { %220 = vmatpush.bf16.msra.mxu1 %v458_v14  ;;  %487 = vmatpush.bf16.msra.mxu3 %v458_v14  ;;  %v438_v25 = vor.u32 %v474_v23, %v437_v22  ;;  %v439_v26 = vld [vmem:[%s869_s2 + $0x58] sm:$0xf0]  ;;  %v429_v29 = vld [vmem:[%s869_s2 + $0x40] sm:$0xf]  ;;  %v472_v30 = vld [vmem:[%s869_s2 + $0x44] sm:$0xf0] }
   0x7   :  { %v503_v21 = vpop.eup %502  ;;  %v442_v28 = vor.u32 %v473_v24, %v439_v26  ;;  %v471_v31 = vld [vmem:[%s869_s2 + $0x44] sm:$0xf]  ;;  %v430_v32 = vor.u32 %v472_v30, %v429_v29  ;;  %v431_v33 = vld [vmem:[%s869_s2 + $0x48] sm:$0xf0]  ;;  %v421_v36 = vld [vmem:[%s869_s2 + $0x30] sm:$0xf] }
   0x8   :  { %v37_v27 = vmul.f32 128.0, %v503_v21  ;;  %v434_v35 = vor.u32 %v471_v31, %v431_v33  ;;  %v470_v37 = vld [vmem:[%s869_s2 + $0x34] sm:$0xf0]  ;;  %v469_v38 = vld [vmem:[%s869_s2 + $0x34] sm:$0xf]  ;;  %vm41_vm0 = vweird.f32 %v503_v21  ;;  %v247_v9 = vld [vmem:[%s870_s3] sm:$0xff] }
   0x9   :  { %202 = vmatpush.bf16.msra.mxu0 %v446_v18  ;;  %480 = vmatpush.bf16.msra.mxu2 %v446_v18  ;;  %v422_v39 = vor.u32 %v470_v37, %v421_v36  ;;  %v423_v40 = vld [vmem:[%s869_s2 + $0x38] sm:$0xf0]  ;;  %v413_v43 = vld [vmem:[%s869_s2 + $0x20] sm:$0xf]  ;;  %v468_v44 = vld [vmem:[%s869_s2 + $0x24] sm:$0xf0] }
   0xa   :  { %221 = vmatpush.bf16.msra.mxu1 %v450_v20  ;;  %488 = vmatpush.bf16.msra.mxu3 %v450_v20  ;;  %v38_v34 = vsub.f32 1.0, %v37_v27  ;;  %v426_v42 = vor.u32 %v469_v38, %v423_v40  ;;  %v467_v45 = vld [vmem:[%s869_s2 + $0x24] sm:$0xf]  ;;  %v414_v46 = vor.u32 %v468_v44, %v413_v43  ;;  %v415_v47 = vld [vmem:[%s869_s2 + $0x28] sm:$0xf0]  ;;  %v537_v10 = vmov 0  }
   0xb   :  { %v418_v49 = vor.u32 %v467_v45, %v415_v47  ;;  %v405_v50 = vld [vmem:[%s869_s2 + $0x10] sm:$0xf]  ;;  %v466_v51 = vld [vmem:[%s869_s2 + $0x14] sm:$0xf0]  ;;  %v465_v52 = vld [vmem:[%s869_s2 + $0x14] sm:$0xf]  ;;  %498 = vset.pattern.permute.xlu2 %v537_v10  ;;  %499 = vset.pattern.permute.xlu0 %v537_v10 }
   0xc   :  { %34 = vadd.xlane.f32.xlu0 %v27_v6  ;;  %30 = vadd.xlane.f32.xlu1 %v25_v7  ;;  %v39_v41 = vmul.f32 %v503_v21, %v38_v34  ;;  %v406_v53 = vor.u32 %v466_v51, %v405_v50  ;;  %v407_v54 = vld [vmem:[%s869_s2 + $0x18] sm:$0xf0]  ;;  %v397_v55 = vld [vmem:[%s869_s2] sm:$0xf]  ;;  %v464_v56 = vld [vmem:[%s869_s2 + $0x4] sm:$0xf0] }
   0xd   :  { %203 = vmatpush.bf16.msra.mxu0 %v438_v25  ;;  %481 = vmatpush.bf16.msra.mxu2 %v438_v25  ;;  %v410_v58 = vor.u32 %v465_v52, %v407_v54  ;;  %v463_v59 = vld [vmem:[%s869_s2 + $0x4] sm:$0xf]  ;;  %v399_v60 = vld [vmem:[%s869_s2 + $0x8] sm:$0xf0]  ;;  %v398_v61 = vor.u32 %v464_v56, %v397_v55  ;;  %vm354_vm1 = vcmp.ne.s32.totalorder %v247_v9, 4294967196  ;;  %v538_v13 = vmov 0.0  }
   0xe   :  { %222 = vmatpush.bf16.msra.mxu1 %v442_v28  ;;  %489 = vmatpush.bf16.msra.mxu3 %v442_v28  ;;  %v40_v48 = vadd.f32 %v503_v21, %v39_v41  ;;  %v402_v2 = vor.u32 %v463_v59, %v399_v60  ;;  %v702_v14 = vsel %vm354_vm1, 1.0, %v538_v13 }
   0xf   :  { %315 = vperm.xlu2 %498, %v247_v9   ;;  %500 = vset.pattern.permute.xlu1 %v537_v10  ;;  %379 = vst.msk [vmem:[%s871_s6] sm:$0xff] %vm374_vm2, %v702_v14  ;;  %v793_v9 = vld [vmem:[%s870_s3 + $0x10] sm:$0xff] }
  0x10   :  { %v42_v57 = vsel %vm41_vm0, %v503_v21, %v40_v48 }
  0x11   :  { %204 = vmatpush.bf16.msra.mxu0 %v430_v32  ;;  %482 = vmatpush.bf16.msra.mxu2 %v430_v32 }
  0x12   :  { %223 = vmatpush.bf16.msra.mxu1 %v434_v35  ;;  %490 = vmatpush.bf16.msra.mxu3 %v434_v35 }
  0x15   :  { %205 = vmatpush.bf16.msra.mxu0 %v422_v39  ;;  %483 = vmatpush.bf16.msra.mxu2 %v422_v39 }
  0x16   :  { %224 = vmatpush.bf16.msra.mxu1 %v426_v42  ;;  %491 = vmatpush.bf16.msra.mxu3 %v426_v42 }
  0x19   :  { %206 = vmatpush.bf16.msra.mxu0 %v414_v46  ;;  %484 = vmatpush.bf16.msra.mxu2 %v414_v46  ;;  %v501_v46 = vld [vmem:[%s868_s1] ss:$0 sm:$0xff] }
  0x1a   :  { %225 = vmatpush.bf16.msra.mxu1 %v418_v49  ;;  %492 = vmatpush.bf16.msra.mxu3 %v418_v49 }
  0x1d   :  { %207 = vmatpush.bf16.msra.mxu0 %v406_v53  ;;  %485 = vmatpush.bf16.msra.mxu2 %v406_v53 }
  0x1e   :  { %226 = vmatpush.bf16.msra.mxu1 %v410_v58  ;;  %493 = vmatpush.bf16.msra.mxu3 %v410_v58 }
  0x21   :  { %208 = vmatpush.bf16.msra.mxu0 %v398_v61  ;;  %486 = vmatpush.bf16.msra.mxu2 %v398_v61 }
  0x22   :  { %227 = vmatpush.bf16.msra.mxu1 %v402_v2  ;;  %494 = vmatpush.bf16.msra.mxu3 %v402_v2 }
  0x69   :  { %v316_v10 = vpop.permute.xlu2 %315 }
  0x77   :  { %v33_v62 = vpop.xlane.xlu0 %32  ;;  %v29_v63 = vpop.xlane.xlu1 %28 }
  0x78   :  { %v45_v3 = vmul.f32 %v42_v57, %v33_v62  ;;  %v43_v6 = vmul.f32 %v42_v57, %v29_v63 }
  0x7a   :  { %v49_v7 = vadd.f32 1e-06, %v45_v3  ;;  %v47_v8 = vadd.f32 1e-06, %v43_v6 }
  0x7c   :  { %504 = vrsqrt.f32 %v49_v7  ;;  %vm57_vm4 = vweird.f32 %v47_v8  ;;  %vm77_vm6 = vweird.f32 %v49_v7 }
  0x7d   :  { %506 = vrsqrt.f32 %v47_v8 }
  0x7f   :  { %v35_v11 = vpop.xlane.xlu0 %34  ;;  %v31_v12 = vpop.xlane.xlu1 %30 }
  0x80   :  { %v46_v15 = vmul.f32 %v42_v57, %v35_v11  ;;  %v44_v16 = vmul.f32 %v42_v57, %v31_v12 }
  0x82   :  { %v505_v17 = vpop.eup %504  ;;  %v50_v18 = vadd.f32 1e-06, %v46_v15  ;;  %v48_v19 = vadd.f32 1e-06, %v44_v16 }
  0x83   :  { %v507_v20 = vpop.eup %506  ;;  %v72_v21 = vmul.f32 %v505_v17, %v49_v7  ;;  %vm78_vm3 = vweird.f32 %v505_v17  ;;  %v781_v7 = vld [vmem:[%s870_s3 + $0x8] sm:$0xff] }
  0x84   :  { %v52_v22 = vmul.f32 %v507_v20, %v47_v8  ;;  %508 = vrsqrt.f32 %v50_v18  ;;  %vm58_vm5 = vweird.f32 %v507_v20  ;;  %vm79_vm7 = vmor %vm77_vm6, %vm78_vm3  ;;  %vm67_vm10 = vweird.f32 %v48_v19  ;;  %v787_v8 = vld [vmem:[%s870_s3 + $0x18] sm:$0xff] }
  0x85   :  { %v73_v23 = vmul.f32 %v505_v17, %v72_v21  ;;  %510 = vrsqrt.f32 %v48_v19  ;;  %vm709_vm8 = vmor %vm57_vm4, %vm58_vm5  ;;  %vm87_vm12 = vweird.f32 %v50_v18 }
  0x86   :  { %v53_v24 = vmul.f32 %v507_v20, %v52_v22 }
  0x87   :  { %v74_v25 = vmul.f32 0.5, %v73_v23 }
  0x88   :  { %v54_v26 = vmul.f32 0.5, %v53_v24 }
  0x89   :  { %v75_v27 = vsub.f32 1.5, %v74_v25 }
  0x8a   :  { %v509_v28 = vpop.eup %508  ;;  %v55_v29 = vsub.f32 1.5, %v54_v26 }
  0x8b   :  { %v511_v30 = vpop.eup %510  ;;  %v82_v31 = vmul.f32 %v509_v28, %v50_v18  ;;  %v76_v33 = vmul.f32 %v505_v17, %v75_v27  ;;  %vm88_vm9 = vweird.f32 %v509_v28  ;;  %v311_v27 = vlaneseq }
  0x8c   :  { %v62_v32 = vmul.f32 %v511_v30, %v48_v19  ;;  %v56_v35 = vmul.f32 %v507_v20, %v55_v29  ;;  %vm68_vm11 = vweird.f32 %v511_v30  ;;  %vm89_vm13 = vmor %vm87_vm12, %vm88_vm9  ;;  %vm356_vm9 = vcmp.ne.s32.totalorder %v793_v9, 4294967196 }
  0x8d   :  { %v83_v34 = vmul.f32 %v509_v28, %v82_v31  ;;  %v80_v41 = vsel %vm79_vm7, %v505_v17, %v76_v33  ;;  %vm69_vm14 = vmor %vm67_vm10, %vm68_vm11  ;;  %vm357_vm10 = vcmp.ne.s32.totalorder %v787_v8, 4294967196 }
  0x8e   :  { %v63_v36 = vmul.f32 %v511_v30, %v62_v32  ;;  %v60_v43 = vsel %vm709_vm8, %v507_v20, %v56_v35  ;;  %v93_v47 = vmul.f32 %v80_v41, %v577_v0  ;;  %v312_v35 = vand.u32 127, %v311_v27 }
  0x8f   :  { %v84_v37 = vmul.f32 0.5, %v83_v34  ;;  %v91_v48 = vmul.f32 %v60_v43, %v582_v1  ;;  %vm355_vm8 = vcmp.ne.s32.totalorder %v781_v7, 4294967196 }
  0x90   :  { %v64_v38 = vmul.f32 0.5, %v63_v36  ;;  %v101_v53 = vmul.f32 %v501_v46, %v93_v47  ;;  %vm326_vm15 = vcmp.eq.s32.totalorder %v312_v35, %v316_v10 }
  0x91   :  { %v85_v40 = vsub.f32 1.5, %v84_v37  ;;  %v99_v55 = vmul.f32 %v501_v46, %v91_v48 }
  0x92   :  { %v65_v42 = vsub.f32 1.5, %v64_v38 }
  0x93   :  { %v86_v44 = vmul.f32 %v509_v28, %v85_v40 }
  0x94   :  { %v66_v45 = vmul.f32 %v511_v30, %v65_v42  ;;  %v313_v42 = vadd.s32 128, %v312_v35 }
  0x95   :  { %v90_v49 = vsel %vm89_vm13, %v509_v28, %v86_v44 }
  0x96   :  { %v70_v50 = vsel %vm69_vm14, %v511_v30, %v66_v45  ;;  %v94_v51 = vmul.f32 %v90_v49, %v591_v4  ;;  %vm327_vm0 = vcmp.eq.s32.totalorder %v313_v42, %v316_v10 }
  0x97   :  { %v92_v52 = vmul.f32 %v70_v50, %v596_v5 }
  0x98   :  { %v102_v54 = vmul.f32 %v501_v46, %v94_v51 }
  0x99   :  { %v100_v56 = vmul.f32 %v501_v46, %v92_v52 }
  0x9a   :  { %v104_v57 = vpack.c.bf16 %v102_v54, %v101_v53 }
  0x9b   :  { %v103_v58 = vpack.c.bf16 %v100_v56, %v99_v55 }
  0x9c   :  { %214 = vmatmul.bf16.vlgmr.msra.gmra.mxu2 %v104_v57  ;;  %233 = vmatmul.bf16.vlgmr.msra.gmra.mxu3 %v104_v57 }
  0x9d   :  { %209 = vmatmul.bf16.vlgmr.msra.gmra.mxu0 %v103_v58  ;;  %228 = vmatmul.bf16.vlgmr.msra.gmra.mxu1 %v103_v58 }
 0x11a   :  { %v722_v0 = vpop.f32.mrf.mxu0  ;;  %v724_v59 = vpop.f32.mrf.mxu1 }
 0x11b   :  { %239 = vst [vmem:[%s872_s4] sm:$0xff] %v722_v0  ;;  %v251_v1 = vmax.f32 %v722_v0, %v724_v59  ;;  %v334_v49 = vsel %vm326_vm15, %v722_v0, 0.0  ;;  %v335_v50 = vsel %vm327_vm0, %v724_v59, 0.0 }
 0x11c   :  { %240 = vst [vmem:[%s872_s4 + $0x8] sm:$0xff] %v724_v59  ;;  %v342_v51 = vadd.f32 %v335_v50, %v334_v49 }
 0x11d   :  { %252 = vmax.xlane.f32.xlu2 %v251_v1 }
 0x11f   :  { %v736_v4 = vpop.f32.mrf.mxu2  ;;  %v738_v5 = vpop.f32.mrf.mxu3 }
 0x120   :  { %243 = vst [vmem:[%s872_s4 + $0x20] sm:$0xff] %v736_v4  ;;  %v257_v60 = vmax.f32 %v736_v4, %v738_v5 }
 0x121   :  { %244 = vst [vmem:[%s872_s4 + $0x28] sm:$0xff] %v738_v5 }
 0x122   :  { %v750_v61 = vpop.f32.mrf.mxu0  ;;  %v752_v62 = vpop.f32.mrf.mxu1  ;;  %258 = vmax.xlane.f32.xlu0 %v257_v60 }
 0x123   :  { %241 = vst [vmem:[%s872_s4 + $0x10] sm:$0xff] %v750_v61  ;;  %v254_v63 = vmax.f32 %v750_v61, %v752_v62 }
 0x124   :  { %242 = vst [vmem:[%s872_s4 + $0x18] sm:$0xff] %v752_v62 }
 0x125   :  { %255 = vmax.xlane.f32.xlu2 %v254_v63 }
 0x127   :  { %v764_v2 = vpop.f32.mrf.mxu2  ;;  %v766_v3 = vpop.f32.mrf.mxu3 }
 0x128   :  { %245 = vst [vmem:[%s872_s4 + $0x30] sm:$0xff] %v764_v2  ;;  %v260_v6 = vmax.f32 %v764_v2, %v766_v3 }
 0x129   :  { %246 = vst [vmem:[%s872_s4 + $0x38] sm:$0xff] %v766_v3 }
 0x12a   :  { %261 = vmax.xlane.f32.xlu1 %v260_v6 }
 0x136   :  { %318 = vperm.xlu0 %499, %v781_v7  }
 0x13d   :  { %324 = vperm.xlu2 %498, %v787_v8  }
 0x143   :  { %321 = vperm.xlu1 %500, %v793_v9  }
 0x190   :  { %v796_v11 = vpop.xlane.xlu2 %252 }
 0x191   :  { %v263_v12 = vsub.f32 %v722_v0, %v796_v11  ;;  %v264_v15 = vsub.f32 %v724_v59, %v796_v11 }
 0x193   :  { %v271_v16 = vmul.f32 1.442695, %v263_v12  ;;  %v273_v17 = vmul.f32 1.442695, %v264_v15 }
 0x195   :  { %512 = vpow2.f32 %v271_v16  ;;  %v802_v18 = vpop.xlane.xlu0 %258 }
 0x196   :  { %514 = vpow2.f32 %v273_v17  ;;  %v267_v19 = vsub.f32 %v736_v4, %v802_v18  ;;  %v268_v20 = vsub.f32 %v738_v5, %v802_v18 }
 0x198   :  { %v279_v21 = vmul.f32 1.442695, %v267_v19  ;;  %v281_v22 = vmul.f32 1.442695, %v268_v20  ;;  %v808_v23 = vpop.xlane.xlu2 %255 }
 0x199   :  { %v265_v24 = vsub.f32 %v750_v61, %v808_v23  ;;  %v266_v25 = vsub.f32 %v752_v62, %v808_v23 }
 0x19a   :  { %516 = vpow2.f32 %v279_v21 }
 0x19b   :  { %v513_v26 = vpop.eup %512  ;;  %518 = vpow2.f32 %v281_v22  ;;  %v275_v28 = vmul.f32 1.442695, %v265_v24  ;;  %v277_v29 = vmul.f32 1.442695, %v266_v25 }
 0x19c   :  { %v515_v30 = vpop.eup %514 }
 0x19d   :  { %520 = vpow2.f32 %v275_v28  ;;  %v287_v31 = vadd.f32 %v515_v30, %v513_v26  ;;  %v814_v32 = vpop.xlane.xlu1 %261 }
 0x19e   :  { %522 = vpow2.f32 %v277_v29  ;;  %v269_v33 = vsub.f32 %v764_v2, %v814_v32  ;;  %v270_v34 = vsub.f32 %v766_v3, %v814_v32 }
 0x19f   :  { %288 = vadd.xlane.f32.xlu2 %v287_v31 }
 0x1a0   :  { %v517_v36 = vpop.eup %516  ;;  %v283_v37 = vmul.f32 1.442695, %v269_v33  ;;  %v285_v38 = vmul.f32 1.442695, %v270_v34  ;;  %v325_v54 = vpop.permute.xlu2 %324 }
 0x1a1   :  { %v519_v39 = vpop.eup %518  ;;  %vm332_vm4 = vcmp.eq.s32.totalorder %v312_v35, %v325_v54  ;;  %vm333_vm5 = vcmp.eq.s32.totalorder %v313_v42, %v325_v54 }
 0x1a2   :  { %524 = vpow2.f32 %v283_v37  ;;  %v293_v40 = vadd.f32 %v519_v39, %v517_v36  ;;  %v340_v0 = vsel %vm332_vm4, %v764_v2, 0.0  ;;  %v341_v59 = vsel %vm333_vm5, %v766_v3, 0.0 }
 0x1a3   :  { %v521_v41 = vpop.eup %520  ;;  %526 = vpow2.f32 %v285_v38  ;;  %v351_v60 = vadd.f32 %v341_v59, %v340_v0 }
 0x1a4   :  { %v523_v43 = vpop.eup %522  ;;  %294 = vadd.xlane.f32.xlu0 %v293_v40 }
 0x1a5   :  { %v290_v44 = vadd.f32 %v523_v43, %v521_v41 }
 0x1a7   :  { %291 = vadd.xlane.f32.xlu1 %v290_v44 }
 0x1a8   :  { %v525_v45 = vpop.eup %524  ;;  %v319_v47 = vpop.permute.xlu0 %318 }
 0x1a9   :  { %v527_v46 = vpop.eup %526  ;;  %vm328_vm1 = vcmp.eq.s32.totalorder %v312_v35, %v319_v47  ;;  %vm329_vm3 = vcmp.eq.s32.totalorder %v313_v42, %v319_v47 }
 0x1aa   :  { %v296_v48 = vadd.f32 %v527_v46, %v525_v45  ;;  %v336_v52 = vsel %vm328_vm1, %v750_v61, 0.0  ;;  %v337_v53 = vsel %vm329_vm3, %v752_v62, 0.0  ;;  %v460_v61 = vsel %vm355_vm8, 1.0, %v538_v13 }
 0x1ab   :  { %v345_v55 = vadd.f32 %v337_v53, %v336_v52  ;;  %380 = vst.msk [vmem:[%s871_s6 + $0x8] sm:$0xff] %vm374_vm2, %v460_v61  ;;  %v462_v62 = vsel %vm357_vm10, 1.0, %v538_v13 }
 0x1ac   :  { %297 = vadd.xlane.f32.xlu2 %v296_v48  ;;  %382 = vst.msk [vmem:[%s871_s6 + $0x18] sm:$0xff] %vm374_vm2, %v462_v62 }
 0x1af   :  { %343 = vadd.xlane.f32.xlu1 %v342_v51 }
 0x1b4   :  { %346 = vadd.xlane.f32.xlu2 %v345_v55 }
 0x1b5   :  { %v322_v56 = vpop.permute.xlu1 %321 }
 0x1b6   :  { %vm330_vm6 = vcmp.eq.s32.totalorder %v312_v35, %v322_v56  ;;  %vm331_vm7 = vcmp.eq.s32.totalorder %v313_v42, %v322_v56 }
 0x1b7   :  { %v338_v57 = vsel %vm330_vm6, %v736_v4, 0.0  ;;  %v339_v58 = vsel %vm331_vm7, %v738_v5, 0.0  ;;  %v461_v4 = vsel %vm356_vm9, 1.0, %v538_v13 }
 0x1b8   :  { %v348_v1 = vadd.f32 %v339_v58, %v338_v57  ;;  %381 = vst.msk [vmem:[%s871_s6 + $0x10] sm:$0xff] %vm374_vm2, %v461_v4 }
 0x1ba   :  { %349 = vadd.xlane.f32.xlu1 %v348_v1 }
 0x1bc   :  { %352 = vadd.xlane.f32.xlu2 %v351_v60 }
 0x212   :  { %v289_v5 = vpop.xlane.xlu2 %288 }
 0x213   :  { %528 = vlog2.f32 %v289_v5 }
 0x217   :  { %v295_v3 = vpop.xlane.xlu0 %294 }
 0x219   :  { %v529_v63 = vpop.eup %528 }
 0x21a   :  { %v292_v2 = vpop.xlane.xlu1 %291  ;;  %v300_v6 = vmul.f32 0.6931472, %v529_v63 }
 0x21b   :  { %530 = vlog2.f32 %v292_v2 }
 0x21c   :  { %532 = vlog2.f32 %v295_v3  ;;  %v307_v8 = vadd.f32 %v300_v6, %v796_v11 }
 0x21f   :  { %v298_v7 = vpop.xlane.xlu2 %297 }
 0x220   :  { %534 = vlog2.f32 %v298_v7 }
 0x221   :  { %v531_v9 = vpop.eup %530 }
 0x222   :  { %v302_v10 = vmul.f32 0.6931472, %v531_v9  ;;  %v344_v12 = vpop.xlane.xlu1 %343  ;;  %v533_v15 = vpop.eup %532 }
 0x223   :  { %v366_v13 = vsub.f32 %v307_v8, %v344_v12  ;;  %v304_v21 = vmul.f32 0.6931472, %v533_v15 }
 0x224   :  { %v308_v17 = vadd.f32 %v302_v10, %v808_v23 }
 0x225   :  { %v370_v16 = vmul.f32 %v702_v14, %v366_v13  ;;  %v309_v14 = vadd.f32 %v304_v21, %v802_v18 }
 0x226   :  { %v535_v19 = vpop.eup %534 }
 0x227   :  { %375 = vst.msk [vmem:[%s873_s5] sm:$0xff] %vm374_vm2, %v370_v16  ;;  %v347_v20 = vpop.xlane.xlu2 %346  ;;  %v306_v24 = vmul.f32 0.6931472, %v535_v19 }
 0x228   :  { %v367_v22 = vsub.f32 %v308_v17, %v347_v20 }
 0x229   :  { %v310_v26 = vadd.f32 %v306_v24, %v814_v32 }
 0x22a   :  { %v371_v25 = vmul.f32 %v460_v61, %v367_v22 }
 0x22c   :  { %376 = vst.msk [vmem:[%s873_s5 + $0x8] sm:$0xff] %vm374_vm2, %v371_v25 }
 0x22d   :  { %v350_v11 = vpop.xlane.xlu1 %349 }
 0x22e   :  { %v368_v23 = vsub.f32 %v309_v14, %v350_v11 }
 0x22f   :  { %v353_v27 = vpop.xlane.xlu2 %352 }
 0x230   :  { %v372_v28 = vmul.f32 %v461_v4, %v368_v23  ;;  %v369_v29 = vsub.f32 %v310_v26, %v353_v27 }
 0x232   :  { %377 = vst.msk [vmem:[%s873_s5 + $0x10] sm:$0xff] %vm374_vm2, %v372_v28  ;;  %v373_v30 = vmul.f32 %v462_v62, %v369_v29 }
 0x234   :  { %378 = vst.msk [vmem:[%s873_s5 + $0x18] sm:$0xff] %vm374_vm2, %v373_v30 }

</bundles_post_ra>
